<compile_context>
chip_gen: v7x
topology: tpu7x:2x2x1
jax: 0.10.0
libtpu: 0.0.40
codegen_flags: <defaults>
</compile_context>

<pallas_src>
import functools
import math

import jax
import jax.numpy as jnp
import numpy as np
from jax import lax
from jax.experimental import pallas as pl
from jax.experimental.pallas import tpu as pltpu

# bf16 operands on the MXU (f32 accumulation everywhere) — several-x MXU throughput on
# v5e/v6e/v7x vs f32 operands.  The end-to-end check at the bottom is loosened to 5e-2
# accordingly (set to jnp.float32 to recover ~1e-4 agreement with the f32 reference).
MATMUL_DTYPE = jnp.bfloat16


# ----------------------------------------------------------------------------
# hardware / tiling helpers
# ----------------------------------------------------------------------------
def _vmem_budget_bytes():
    """~96 MiB on 128-MiB parts (v5e/v6e), ~48 MiB on 64-MiB parts (v7x)."""
    cap = 128 * 1024 * 1024
    try:
        cap = int(getattr(pltpu.get_tpu_info(), "vmem_capacity_bytes", cap))
    except Exception:
        pass
    return min(96 * 1024 * 1024, (cap * 3) // 4)


def _row_tile(n, target):
    """Largest row tile <= target that divides n and is a multiple of 8 (else n)."""
    if n <= target:
        return n
    t = target - (target % 8)
    while t >= 8:
        if n % t == 0:
            return t
        t -= 8
    return n


def _chunk_size(slen, target=64):
    """Delta-rule chunk length: multiple of 8 dividing slen (else slen).

    target=64 per perf review: with the blocked solve the per-token solve cost
    scales ~C, so moderate chunks win; sweep 64 vs 128 for a given model size.
    """
    c = min(slen, target)
    c -= c % 8
    while c >= 8:
        if slen % c == 0:
            return c
        c -= 8
    return slen


def _sub_block(c):
    """Forward-substitution sub-block size: largest of {32,16,8} dividing C."""
    for r in (32, 16, 8):
        if c % r == 0:
            return r
    return c


# ----------------------------------------------------------------------------
# Kernel 1: LayerNorm + fused slow_net projection + elu_p1 / sum_norm / sigmoid
# ----------------------------------------------------------------------------
def ln_proj_kernel(x_ref, g_ref, b_ref, w_ref, ones_ref, o_ref, *, hd, compute_dtype):
    f32 = jnp.float32
    cd = compute_dtype

    x = x_ref[...]                                            # (TM, in_dim) f32
    mean = jnp.mean(x, axis=-1, keepdims=True)
    var = jnp.mean(jnp.square(x - mean), axis=-1, keepdims=True)
    xln = (x - mean) * lax.rsqrt(var + 1e-5)
    xln = xln * g_ref[...] + b_ref[...]

    # one fused MXU projection: columns = [Wq | Wk | Wv | Wbeta-repeated-per-lane]
    p = jnp.dot(xln.astype(cd), w_ref[...].astype(cd), preferred_element_type=f32)

    q = p[:, 0 * hd:1 * hd]
    k = p[:, 1 * hd:2 * hd]
    v = p[:, 2 * hd:3 * hd]
    bl = p[:, 3 * hd:4 * hd]                                  # beta logits, lane-dense

    # elu(x, 1.0) + 1  ==  x + 1  (x > 0)  else  exp(x)
    q = jnp.where(q > 0, q + 1.0, jnp.exp(q))
    k = jnp.where(k > 0, k + 1.0, jnp.exp(k))

    # per-head sum-normalisation via a PINNED block-diagonal all-ones matmul
    # (stays on the MXU; the constant is DMA'd once, never rebuilt per step)
    ones_bd = ones_ref[...]
    q = q / jnp.dot(q.astype(cd), ones_bd, preferred_element_type=f32)
    k = k / jnp.dot(k.astype(cd), ones_bd, preferred_element_type=f32)

    beta = jax.nn.sigmoid(bl)                                 # lane-dense sigmoid(beta)

    # single lane-dense store of the whole [q|k|v|beta] slab
    o_ref[...] = jnp.concatenate([q, k, v, beta], axis=-1).astype(o_ref.dtype)


# ----------------------------------------------------------------------------
# Kernel 2: chunkwise-parallel delta-rule recurrence + fused out-proj + residual
#   grid = (bsz, n_chunks); per-head (D, D) fast weights in VMEM; all matmuls bf16.
# ----------------------------------------------------------------------------
def fw_chunk_kernel(qkvb_ref, x_ref, sl_ref, li_ref, wo_ref, o_ref,
                    w_ref, ob_ref, u_ref, *,
                    num_head, dim_head, sub_block, compute_dtype):
    H, D = num_head, dim_head
    HD = H * D
    C = qkvb_ref.shape[1]                   # chunk length (static)
    R = sub_block                           # forward-substitution sub-block rows
    nb = C // R
    nd = int(math.ceil(math.log2(R))) if R > 1 else 0
    f32 = jnp.float32
    cd = compute_dtype

    # fast weights start at zero at the first chunk of every batch
    @pl.when(pl.program_id(1) == 0)
    def _():
        w_ref[...] = jnp.zeros_like(w_ref)

    qkvb = qkvb_ref[0]                      # (C, 4*HD)  [q|k|v|beta], beta lane-dense
    sl = sl_ref[...]                        # (C, C) strictly-lower mask (pinned)
    li = li_ref[...]                        # (C, C) lower-incl mask (pinned)

    def mm(a, b):                           # a @ b        (bf16 operands, f32 acc)
        return jnp.dot(a.astype(cd), b.astype(cd), preferred_element_type=f32)

    def mm_nt(a, b):                        # a @ b.T
        return lax.dot_general(a.astype(cd), b.astype(cd),
                               (((1,), (1,)), ((), ())), preferred_element_type=f32)

    def mm_tn(a, b):                        # a.T @ b
        return lax.dot_general(a.astype(cd), b.astype(cd),
                               (((0,), (0,)), ((), ())), preferred_element_type=f32)

    for h in range(H):                      # static per-head loop
        qh = qkvb[:, 0 * HD + h * D:0 * HD + (h + 1) * D]          # (C, D)
        kh = qkvb[:, 1 * HD + h * D:1 * HD + (h + 1) * D]
        vh = qkvb[:, 2 * HD + h * D:2 * HD + (h + 1) * D].astype(f32)
        bh = qkvb[:, 3 * HD + h * D:3 * HD + (h + 1) * D].astype(f32)  # lane-dense beta
        bcol = bh[:, :1]                                               # (C, 1)

        w0 = w_ref[h]                        # (D, D) f32 chunk-start fast weight

        kw = mm(kh, w0)                      # K_h @ W0_h                 (C, D)
        qw = mm(qh, w0)                      # Q_h @ W0_h                 (C, D)
        rhs = bh * (vh - kw)                 # diag(beta)(V - K W0)       (C, D)

        # M = -strict_lower(diag(beta) K K^T); solve (I - M) U = RHS, i.e. the
        # unit-lower-triangular delta-rule system, via blocked forward substitution.
        a = mm_nt(kh, kh)                    # (C, C)
        m = -(bcol * a) * sl

        for i in range(nb):
            r0 = i * R
            rhs_i = rhs[r0:r0 + R]
            if i > 0:                        # fold in already-solved rows
                rhs_i = rhs_i + mm(m[r0:r0 + R, :r0], u_ref[:r0])
            m_ii = m[r0:r0 + R, r0:r0 + R]
            # within-block solve: RHS-only Neumann doubling -> (R,R)x(R,D) matmuls
            u_i = rhs_i + mm(m_ii, rhs_i)
            p = m_ii
            for _ in range(nd - 1):
                p = mm(p, p)
                u_i = u_i + mm(p, u_i)
            u_ref[r0:r0 + R, :] = u_i
        u = u_ref[...]                       # (C, D)   u_t = delta_t

        # out_t = q_t W_t = q_t W0 + sum_{s<=t} (q_t . k_s) u_s
        qk = mm_nt(qh, kh) * li
        ob_ref[:, h * D:(h + 1) * D] = qw + mm(qk, u)

        # W <- W0 + K^T U
        w_ref[h] = w0 + mm_tn(kh, u)

    # fused out-projection + residual add (output aliased onto the residual buffer)
    o_ref[0] = (x_ref[0] + jnp.dot(ob_ref[...].astype(cd), wo_ref[...].astype(cd),
                                   preferred_element_type=f32)).astype(o_ref.dtype)


# ----------------------------------------------------------------------------
# Weight preparation (once, outside the hot path): fused projection + bf16 storage
# ----------------------------------------------------------------------------
def prepare_weights(w_slow, w_out, num_head, dim_head, dtype=MATMUL_DTYPE):
    H, D = num_head, dim_head
    in_dim = w_slow.shape[1]
    w = w_slow.reshape(H, 3 * D + 1, in_dim)

    def cols(block):                         # (H, D, in_dim) -> (in_dim, H*D)
        return jnp.transpose(block, (2, 0, 1)).reshape(in_dim, H * D)

    w_q = cols(w[:, 0 * D:1 * D, :])
    w_k = cols(w[:, 1 * D:2 * D, :])
    w_v = cols(w[:, 2 * D:3 * D, :])
    # beta weight row repeated D times per head -> lane-dense beta straight out of MXU
    w_b = jnp.transpose(jnp.repeat(w[:, 3 * D, :], D, axis=0), (1, 0))
    w_all = jnp.concatenate([w_q, w_k, w_v, w_b], axis=1).astype(dtype)  # (in, 4*H*D)
    w_out_t = jnp.transpose(w_out, (1, 0)).astype(dtype)                 # (H*D, in)
    return w_all, w_out_t


# ----------------------------------------------------------------------------
# Wrapper
# ----------------------------------------------------------------------------
@functools.partial(jax.jit, static_argnames=("num_head", "dim_head"))
def fast_ff_layer(x, gamma, beta_ln, w_all, w_out_t, *, num_head, dim_head):
    """x: (slen, bsz, in_dim) float32.  Returns (slen, bsz, in_dim)."""
    H, D = num_head, dim_head
    HD = H * D
    slen, bsz, in_dim = x.shape
    N = bsz * slen

    vmem_budget = _vmem_budget_bytes()

    def cparams(sem):
        return pltpu.CompilerParams(dimension_semantics=sem,
                                    vmem_limit_bytes=vmem_budget)

    # batch-major token layout so the recurrence reads contiguous per-batch sequences
    x2 = jnp.transpose(x, (1, 0, 2)).reshape(N, in_dim)

    # pinned constants (constant index_map -> DMA'd once per pallas_call)
    iota_hd = jnp.arange(HD)
    ones_bd = (iota_hd[:, None] // D == iota_hd[None, :] // D).astype(MATMUL_DTYPE)

    # --- kernel 1: LayerNorm + fused slow_net + elu_p1 / sum_norm / sigmoid --------
    TM = _row_tile(N, target=1024 if vmem_budget >= 80 * 1024 * 1024 else 512)
    tok = lambda i: (i, 0)
    pin1 = lambda i: (0, 0)
    # NOTE: on v7x the pinned bf16 weights could additionally use
    # pipeline_mode=pl.Buffered(1) (they never refetch) to halve their VMEM footprint.
    qkvb = pl.pallas_call(
        functools.partial(ln_proj_kernel, hd=HD, compute_dtype=MATMUL_DTYPE),
        grid=(N // TM,),
        in_specs=[pl.BlockSpec((TM, in_dim), tok),
                  pl.BlockSpec((1, in_dim), pin1),
                  pl.BlockSpec((1, in_dim), pin1),
                  pl.BlockSpec((in_dim, 4 * HD), pin1),
                  pl.BlockSpec((HD, HD), pin1)],
        out_specs=pl.BlockSpec((TM, 4 * HD), tok),
        out_shape=jax.ShapeDtypeStruct((N, 4 * HD), MATMUL_DTYPE),
        compiler_params=cparams(("parallel",)),
    )(x2, gamma.reshape(1, in_dim), beta_ln.reshape(1, in_dim), w_all, ones_bd)

    # --- kernel 2: delta-rule recurrence + fused out-proj + residual ---------------
    C = _chunk_size(slen)
    R = _sub_block(C)
    iota_c = jnp.arange(C)
    strict_lower = (iota_c[:, None] > iota_c[None, :]).astype(jnp.float32)
    lower_incl = (iota_c[:, None] >= iota_c[None, :]).astype(jnp.float32)

    qkvb3 = qkvb.reshape(bsz, slen, 4 * HD)
    x3 = x2.reshape(bsz, slen, in_dim)

    seq_spec = lambda w: pl.BlockSpec((1, C, w), lambda b, c: (b, c, 0))
    pin2 = lambda shape: pl.BlockSpec(shape, lambda b, c: (0, 0))

    out3 = pl.pallas_call(
        functools.partial(fw_chunk_kernel, num_head=H, dim_head=D,
                          sub_block=R, compute_dtype=MATMUL_DTYPE),
        grid=(bsz, slen // C),
        in_specs=[seq_spec(4 * HD),          # q|k|v|beta slab (bf16)
                  seq_spec(in_dim),          # residual x (f32)
                  pin2((C, C)),              # strict lower mask
                  pin2((C, C)),              # lower-incl mask
                  pin2((HD, in_dim))],       # out-projection weight (bf16)
        out_specs=seq_spec(in_dim),
        out_shape=jax.ShapeDtypeStruct((bsz, slen, in_dim), jnp.float32),
        scratch_shapes=[pltpu.VMEM((H, D, D), jnp.float32),   # fast weights (per head)
                        pltpu.VMEM((C, HD), jnp.float32),     # chunk output buffer
                        pltpu.VMEM((C, D), jnp.float32)],     # per-head u (delta) buffer
        input_output_aliases={1: 0},                          # write onto residual buf
        compiler_params=cparams(("parallel", "arbitrary")),
    )(qkvb3, x3, strict_lower, lower_incl, w_out_t)

    return jnp.transpose(out3, (1, 0, 2))


# ----------------------------------------------------------------------------
# Pure-JAX reference (mirrors the PyTorch forward exactly, f32 everywhere)
# ----------------------------------------------------------------------------
def reference(x, gamma, beta_ln, w_slow, w_out, num_head, dim_head):
    slen, bsz, in_dim = x.shape
    mean = jnp.mean(x, axis=-1, keepdims=True)
    var = jnp.mean((x - mean) ** 2, axis=-1, keepdims=True)
    xln = (x - mean) / jnp.sqrt(var + 1e-5) * gamma + beta_ln
    qkvb = xln @ w_slow.T
    qkvb = qkvb.reshape(slen, bsz, num_head, 3 * dim_head + 1)
    q = qkvb[..., :dim_head]
    k = qkvb[..., dim_head:2 * dim_head]
    v = qkvb[..., 2 * dim_head:3 * dim_head]
    b = jax.nn.sigmoid(qkvb[..., 3 * dim_head:])
    q, k, v, b = (jnp.transpose(t, (1, 2, 0, 3)) for t in (q, k, v, b))
    q = jax.nn.elu(q) + 1.0
    k = jax.nn.elu(k) + 1.0
    q = q / jnp.sum(q, axis=-1, keepdims=True)
    k = k / jnp.sum(k, axis=-1, keepdims=True)

    B, H, L, D = q.shape
    W0 = jnp.zeros((B, H, D, D), jnp.float32)

    def step(W, inp):
        qt, kt, vt, bt = inp
        v_old = jnp.einsum('bhd,bhde->bhe', kt, W)
        delta = bt * (vt - v_old)
        W = W + jnp.einsum('bhd,bhe->bhde', kt, delta)
        out = jnp.einsum('bhd,bhde->bhe', qt, W)
        return W, out

    seq_first = lambda t: jnp.moveaxis(t, 2, 0)
    _, outs = lax.scan(step, W0, (seq_first(q), seq_first(k), seq_first(v), seq_first(b)))
    fw_out = jnp.moveaxis(outs, 0, 2)                     # (B, H, L, D)

    h = jnp.transpose(fw_out, (0, 2, 1, 3)).reshape(B, L, H * D)
    h = jnp.transpose(h, (1, 0, 2))                        # (L, B, H*D)
    return x + h @ w_out.T


# ----------------------------------------------------------------------------
if __name__ == "__main__":
    num_head, dim_head, in_dim = 4, 8, 32
    slen, bsz = 8, 2

    key = jax.random.PRNGKey(0)
    k_x, k_ws, k_wo = jax.random.split(key, 3)

    x = jax.random.normal(k_x, (slen, bsz, in_dim), jnp.float32)

    # Deterministic parameter init (PyTorch-style uniform bounds), LayerNorm affine = (1, 0)
    bound_s = 1.0 / np.sqrt(in_dim)
    w_slow = jax.random.uniform(k_ws, (num_head * (3 * dim_head + 1), in_dim),
                                jnp.float32, -bound_s, bound_s)
    bound_o = 1.0 / np.sqrt(num_head * dim_head)
    w_out = jax.random.uniform(k_wo, (in_dim, num_head * dim_head),
                               jnp.float32, -bound_o, bound_o)
    gamma = jnp.ones((in_dim,), jnp.float32)
    beta_ln = jnp.zeros((in_dim,), jnp.float32)

    w_all, w_out_t = prepare_weights(w_slow, w_out, num_head, dim_head)

    out = fast_ff_layer(x, gamma, beta_ln, w_all, w_out_t,
                        num_head=num_head, dim_head=dim_head)
    out = jax.block_until_ready(out)

    ref = reference(x, gamma, beta_ln, w_slow, w_out, num_head, dim_head)
    # bf16 MXU operands (f32 accumulation) vs an all-f32 reference -> loosened tolerance.
    np.testing.assert_allclose(np.asarray(out), np.asarray(ref), rtol=5e-2, atol=5e-2)

    print("KERNEL_OK")
</pallas_src>

<mosaic_0001>
module attributes {stable_mosaic.version = 11 : i64} {
  func.func @ln_proj_kernel(%arg0: i32, %arg1: memref<16x32xf32, #tpu.memory_space<vmem>>, %arg2: memref<1x32xf32, #tpu.memory_space<vmem>>, %arg3: memref<1x32xf32, #tpu.memory_space<vmem>>, %arg4: memref<32x128xbf16, #tpu.memory_space<vmem>>, %arg5: memref<32x32xbf16, #tpu.memory_space<vmem>>, %arg6: memref<16x128xbf16, #tpu.memory_space<vmem>>) attributes {dimension_semantics = [#tpu.dimension_semantics<parallel>], iteration_bounds = array<i64: 1>, scalar_prefetch = 0 : i64, scratch_operands = 0 : i64, tpu.core_type = #tpu.core_type<tc>, window_params = [{transform_indices = @transform_0, window_bounds = array<i64: 16, 32>}, {pipeline_mode = #tpu.pipeline_mode<synchronous>, transform_indices = @transform_1, window_bounds = array<i64: 1, 32>}, {pipeline_mode = #tpu.pipeline_mode<synchronous>, transform_indices = @transform_2, window_bounds = array<i64: 1, 32>}, {pipeline_mode = #tpu.pipeline_mode<synchronous>, transform_indices = @transform_3, window_bounds = array<i64: 32, 128>}, {pipeline_mode = #tpu.pipeline_mode<synchronous>, transform_indices = @transform_4, window_bounds = array<i64: 32, 32>}, {transform_indices = @transform_5, window_bounds = array<i64: 16, 128>}]} {
    %c0 = arith.constant 0 : index
    %c0_0 = arith.constant 0 : index
    %0 = vector.load %arg1[%c0, %c0_0] : memref<16x32xf32, #tpu.memory_space<vmem>>, vector<16x32xf32>
    %cst = arith.constant dense<0.000000e+00> : vector<16xf32>
    %1 = vector.multi_reduction <add>, %0, %cst [1] : vector<16x32xf32> to vector<16xf32>
    %2 = vector.shape_cast %1 : vector<16xf32> to vector<16x1xf32>
    %cst_1 = arith.constant 3.200000e+01 : f32
    %3 = vector.broadcast %cst_1 : f32 to vector<16x1xf32>
    %4 = arith.divf %2, %3 : vector<16x1xf32>
    %5 = vector.broadcast %4 : vector<16x1xf32> to vector<16x32xf32>
    %6 = arith.subf %0, %5 : vector<16x32xf32>
    %7 = arith.mulf %6, %6 : vector<16x32xf32>
    %cst_2 = arith.constant dense<0.000000e+00> : vector<16xf32>
    %8 = vector.multi_reduction <add>, %7, %cst_2 [1] : vector<16x32xf32> to vector<16xf32>
    %9 = vector.shape_cast %8 : vector<16xf32> to vector<16x1xf32>
    %cst_3 = arith.constant 3.200000e+01 : f32
    %10 = vector.broadcast %cst_3 : f32 to vector<16x1xf32>
    %11 = arith.divf %9, %10 : vector<16x1xf32>
    %12 = vector.broadcast %4 : vector<16x1xf32> to vector<16x32xf32>
    %13 = arith.subf %0, %12 : vector<16x32xf32>
    %cst_4 = arith.constant 9.99999974E-6 : f32
    %14 = vector.broadcast %cst_4 : f32 to vector<16x1xf32>
    %15 = arith.addf %11, %14 : vector<16x1xf32>
    %16 = math.rsqrt %15 : vector<16x1xf32>
    %17 = vector.broadcast %16 : vector<16x1xf32> to vector<16x32xf32>
    %18 = arith.mulf %13, %17 : vector<16x32xf32>
    %c0_5 = arith.constant 0 : index
    %c0_6 = arith.constant 0 : index
    %19 = vector.load %arg2[%c0_5, %c0_6] : memref<1x32xf32, #tpu.memory_space<vmem>>, vector<1x32xf32>
    %20 = vector.broadcast %19 : vector<1x32xf32> to vector<16x32xf32>
    %21 = arith.mulf %18, %20 : vector<16x32xf32>
    %c0_7 = arith.constant 0 : index
    %c0_8 = arith.constant 0 : index
    %22 = vector.load %arg3[%c0_7, %c0_8] : memref<1x32xf32, #tpu.memory_space<vmem>>, vector<1x32xf32>
    %23 = vector.broadcast %22 : vector<1x32xf32> to vector<16x32xf32>
    %24 = arith.addf %21, %23 : vector<16x32xf32>
    %25 = arith.truncf %24 : vector<16x32xf32> to vector<16x32xbf16>
    %c0_9 = arith.constant 0 : index
    %c0_10 = arith.constant 0 : index
    %26 = vector.load %arg4[%c0_9, %c0_10] : memref<32x128xbf16, #tpu.memory_space<vmem>>, vector<32x128xbf16>
    %cst_11 = arith.constant dense<0.000000e+00> : vector<16x128xf32>
    %27 = tpu.matmul %25, %26, %cst_11 {dimension_numbers = #tpu.dot_dimension_numbers<[1], [0], [0], [1], [0, 0, 1, 1], [], []>} : vector<16x32xbf16>, vector<32x128xbf16>, vector<16x128xf32> -> vector<16x128xf32>
    %28 = vector.extract_strided_slice %27 {offsets = [0, 0], sizes = [16, 32], strides = [1, 1]} : vector<16x128xf32> to vector<16x32xf32>
    %29 = vector.extract_strided_slice %27 {offsets = [0, 32], sizes = [16, 32], strides = [1, 1]} : vector<16x128xf32> to vector<16x32xf32>
    %30 = vector.extract_strided_slice %27 {offsets = [0, 64], sizes = [16, 32], strides = [1, 1]} : vector<16x128xf32> to vector<16x32xf32>
    %31 = vector.extract_strided_slice %27 {offsets = [0, 96], sizes = [16, 32], strides = [1, 1]} : vector<16x128xf32> to vector<16x32xf32>
    %cst_12 = arith.constant 0.000000e+00 : f32
    %32 = vector.broadcast %cst_12 : f32 to vector<16x32xf32>
    %33 = arith.cmpf ogt, %28, %32 : vector<16x32xf32>
    %cst_13 = arith.constant 1.000000e+00 : f32
    %34 = vector.broadcast %cst_13 : f32 to vector<16x32xf32>
    %35 = arith.addf %28, %34 : vector<16x32xf32>
    %36 = math.exp %28 : vector<16x32xf32>
    %37 = arith.select %33, %35, %36 : vector<16x32xi1>, vector<16x32xf32>
    %cst_14 = arith.constant 0.000000e+00 : f32
    %38 = vector.broadcast %cst_14 : f32 to vector<16x32xf32>
    %39 = arith.cmpf ogt, %29, %38 : vector<16x32xf32>
    %cst_15 = arith.constant 1.000000e+00 : f32
    %40 = vector.broadcast %cst_15 : f32 to vector<16x32xf32>
    %41 = arith.addf %29, %40 : vector<16x32xf32>
    %42 = math.exp %29 : vector<16x32xf32>
    %43 = arith.select %39, %41, %42 : vector<16x32xi1>, vector<16x32xf32>
    %c0_16 = arith.constant 0 : index
    %c0_17 = arith.constant 0 : index
    %44 = vector.load %arg5[%c0_16, %c0_17] : memref<32x32xbf16, #tpu.memory_space<vmem>>, vector<32x32xbf16>
    %45 = arith.truncf %37 : vector<16x32xf32> to vector<16x32xbf16>
    %cst_18 = arith.constant dense<0.000000e+00> : vector<16x32xf32>
    %46 = tpu.matmul %45, %44, %cst_18 {dimension_numbers = #tpu.dot_dimension_numbers<[1], [0], [0], [1], [0, 0, 1, 1], [], []>} : vector<16x32xbf16>, vector<32x32xbf16>, vector<16x32xf32> -> vector<16x32xf32>
    %47 = arith.divf %37, %46 : vector<16x32xf32>
    %48 = arith.truncf %43 : vector<16x32xf32> to vector<16x32xbf16>
    %cst_19 = arith.constant dense<0.000000e+00> : vector<16x32xf32>
    %49 = tpu.matmul %48, %44, %cst_19 {dimension_numbers = #tpu.dot_dimension_numbers<[1], [0], [0], [1], [0, 0, 1, 1], [], []>} : vector<16x32xbf16>, vector<32x32xbf16>, vector<16x32xf32> -> vector<16x32xf32>
    %50 = arith.divf %43, %49 : vector<16x32xf32>
    %51 = arith.negf %31 : vector<16x32xf32>
    %52 = math.exp %51 : vector<16x32xf32>
    %cst_20 = arith.constant 1.000000e+00 : f32
    %53 = vector.broadcast %cst_20 : f32 to vector<16x32xf32>
    %54 = arith.addf %53, %52 : vector<16x32xf32>
    %55 = arith.divf %53, %54 : vector<16x32xf32>
    %56 = tpu.concatenate %47, %50, %30, %55 in 1 : vector<16x32xf32>, vector<16x32xf32>, vector<16x32xf32>, vector<16x32xf32> -> vector<16x128xf32>
    %57 = arith.truncf %56 : vector<16x128xf32> to vector<16x128xbf16>
    %c0_21 = arith.constant 0 : index
    %c0_22 = arith.constant 0 : index
    %58 = vector.load %arg6[%c0_21, %c0_22] : memref<16x128xbf16, #tpu.memory_space<vmem>>, vector<16x128xbf16>
    tpu.vector_store %arg6[%c0_21, %c0_22], %57 {strides = array<i32>} : memref<16x128xbf16, #tpu.memory_space<vmem>>, vector<16x128xbf16>,
    return
  }
  func.func @transform_0(%arg0: i32) -> (i32, i32) {
    %c0_i32 = arith.constant 0 : i32
    %c0_i32_0 = arith.constant 0 : i32
    return %arg0, %c0_i32 : i32, i32
  }
  func.func @transform_1(%arg0: i32) -> (i32, i32) {
    %c0_i32 = arith.constant 0 : i32
    %c0_i32_0 = arith.constant 0 : i32
    %c0_i32_1 = arith.constant 0 : i32
    return %c0_i32, %c0_i32_0 : i32, i32
  }
  func.func @transform_2(%arg0: i32) -> (i32, i32) {
    %c0_i32 = arith.constant 0 : i32
    %c0_i32_0 = arith.constant 0 : i32
    %c0_i32_1 = arith.constant 0 : i32
    return %c0_i32, %c0_i32_0 : i32, i32
  }
  func.func @transform_3(%arg0: i32) -> (i32, i32) {
    %c0_i32 = arith.constant 0 : i32
    %c0_i32_0 = arith.constant 0 : i32
    %c0_i32_1 = arith.constant 0 : i32
    return %c0_i32, %c0_i32_0 : i32, i32
  }
  func.func @transform_4(%arg0: i32) -> (i32, i32) {
    %c0_i32 = arith.constant 0 : i32
    %c0_i32_0 = arith.constant 0 : i32
    %c0_i32_1 = arith.constant 0 : i32
    return %c0_i32, %c0_i32_0 : i32, i32
  }
  func.func @transform_5(%arg0: i32) -> (i32, i32) {
    %c0_i32 = arith.constant 0 : i32
    %c0_i32_0 = arith.constant 0 : i32
    return %arg0, %c0_i32 : i32, i32
  }
}

module attributes {stable_mosaic.version = 11 : i64} {
  func.func @fw_chunk_kernel(%arg0: i32, %arg1: i32, %arg2: memref<1x8x128xbf16, #tpu.memory_space<vmem>>, %arg3: memref<1x8x32xf32, #tpu.memory_space<vmem>>, %arg4: memref<8x8xf32, #tpu.memory_space<vmem>>, %arg5: memref<8x8xf32, #tpu.memory_space<vmem>>, %arg6: memref<32x32xbf16, #tpu.memory_space<vmem>>, %arg7: memref<1x8x32xf32, #tpu.memory_space<vmem>>, %arg8: memref<4x8x8xf32, #tpu.memory_space<vmem>>, %arg9: memref<8x32xf32, #tpu.memory_space<vmem>>, %arg10: memref<8x8xf32, #tpu.memory_space<vmem>>) attributes {dimension_semantics = [#tpu.dimension_semantics<parallel>, #tpu.dimension_semantics<arbitrary>], iteration_bounds = array<i64: 2, 1>, scalar_prefetch = 0 : i64, scratch_operands = 3 : i64, tpu.core_type = #tpu.core_type<tc>, window_params = [{transform_indices = @transform_0, window_bounds = array<i64: 1, 8, 128>}, {transform_indices = @transform_1, window_bounds = array<i64: 1, 8, 32>}, {pipeline_mode = #tpu.pipeline_mode<synchronous>, transform_indices = @transform_2, window_bounds = array<i64: 8, 8>}, {pipeline_mode = #tpu.pipeline_mode<synchronous>, transform_indices = @transform_3, window_bounds = array<i64: 8, 8>}, {pipeline_mode = #tpu.pipeline_mode<synchronous>, transform_indices = @transform_4, window_bounds = array<i64: 32, 32>}, {transform_indices = @transform_5, window_bounds = array<i64: 1, 8, 32>}]} {
    %c0_i32 = arith.constant 0 : i32
    %0 = arith.cmpi eq, %arg1, %c0_i32 : i32
    %1 = arith.extui %0 : i1 to i32
    %c0_i32_0 = arith.constant 0 : i32
    %2 = arith.cmpi ne, %1, %c0_i32_0 : i32
    scf.if %2 {
      %cst_107 = arith.constant 0.000000e+00 : f32
      %233 = vector.broadcast %cst_107 : f32 to vector<4x8x8xf32>
      %c0_108 = arith.constant 0 : index
      %c0_109 = arith.constant 0 : index
      %c0_110 = arith.constant 0 : index
      %234 = vector.load %arg8[%c0_108, %c0_109, %c0_110] : memref<4x8x8xf32, #tpu.memory_space<vmem>>, vector<4x8x8xf32>
      tpu.vector_store %arg8[%c0_108, %c0_109, %c0_110], %233 {strides = array<i32>} : memref<4x8x8xf32, #tpu.memory_space<vmem>>, vector<4x8x8xf32>,
    } else {
    }
    %c0 = arith.constant 0 : index
    %c0_1 = arith.constant 0 : index
    %c0_2 = arith.constant 0 : index
    %3 = vector.load %arg2[%c0, %c0_1, %c0_2] : memref<1x8x128xbf16, #tpu.memory_space<vmem>>, vector<1x8x128xbf16>
    %4 = vector.shape_cast %3 : vector<1x8x128xbf16> to vector<8x128xbf16>
    %c0_3 = arith.constant 0 : index
    %c0_4 = arith.constant 0 : index
    %5 = vector.load %arg4[%c0_3, %c0_4] : memref<8x8xf32, #tpu.memory_space<vmem>>, vector<8x8xf32>
    %c0_5 = arith.constant 0 : index
    %c0_6 = arith.constant 0 : index
    %6 = vector.load %arg5[%c0_5, %c0_6] : memref<8x8xf32, #tpu.memory_space<vmem>>, vector<8x8xf32>
    %7 = vector.extract_strided_slice %4 {offsets = [0, 0], sizes = [8, 8], strides = [1, 1]} : vector<8x128xbf16> to vector<8x8xbf16>
    %8 = vector.extract_strided_slice %4 {offsets = [0, 32], sizes = [8, 8], strides = [1, 1]} : vector<8x128xbf16> to vector<8x8xbf16>
    %9 = vector.extract_strided_slice %4 {offsets = [0, 64], sizes = [8, 8], strides = [1, 1]} : vector<8x128xbf16> to vector<8x8xbf16>
    %10 = arith.extf %9 : vector<8x8xbf16> to vector<8x8xf32>
    %11 = vector.extract_strided_slice %4 {offsets = [0, 96], sizes = [8, 8], strides = [1, 1]} : vector<8x128xbf16> to vector<8x8xbf16>
    %12 = arith.extf %11 : vector<8x8xbf16> to vector<8x8xf32>
    %13 = vector.extract_strided_slice %12 {offsets = [0, 0], sizes = [8, 1], strides = [1, 1]} : vector<8x8xf32> to vector<8x1xf32>
    %c0_7 = arith.constant 0 : index
    %c0_8 = arith.constant 0 : index
    %c0_9 = arith.constant 0 : index
    %14 = vector.load %arg8[%c0_7, %c0_8, %c0_9] : memref<4x8x8xf32, #tpu.memory_space<vmem>>, vector<1x8x8xf32>
    %15 = vector.shape_cast %14 : vector<1x8x8xf32> to vector<8x8xf32>
    %16 = arith.truncf %15 : vector<8x8xf32> to vector<8x8xbf16>
    %cst = arith.constant dense<0.000000e+00> : vector<8x8xf32>
    %17 = tpu.matmul %8, %16, %cst {dimension_numbers = #tpu.dot_dimension_numbers<[1], [0], [0], [1], [0, 0, 1, 1], [], []>} : vector<8x8xbf16>, vector<8x8xbf16>, vector<8x8xf32> -> vector<8x8xf32>
    %18 = arith.truncf %15 : vector<8x8xf32> to vector<8x8xbf16>
    %cst_10 = arith.constant dense<0.000000e+00> : vector<8x8xf32>
    %19 = tpu.matmul %7, %18, %cst_10 {dimension_numbers = #tpu.dot_dimension_numbers<[1], [0], [0], [1], [0, 0, 1, 1], [], []>} : vector<8x8xbf16>, vector<8x8xbf16>, vector<8x8xf32> -> vector<8x8xf32>
    %20 = arith.subf %10, %17 : vector<8x8xf32>
    %21 = arith.mulf %12, %20 : vector<8x8xf32>
    %cst_11 = arith.constant dense<0.000000e+00> : vector<8x8xf32>
    %22 = tpu.matmul %8, %8, %cst_11 {dimension_numbers = #tpu.dot_dimension_numbers<[1], [1], [0], [0], [0, 0, 1, 0], [], []>} : vector<8x8xbf16>, vector<8x8xbf16>, vector<8x8xf32> -> vector<8x8xf32>
    %23 = vector.broadcast %13 : vector<8x1xf32> to vector<8x8xf32>
    %24 = arith.mulf %23, %22 : vector<8x8xf32>
    %cst_12 = arith.constant 0.000000e+00 : f32
    %25 = vector.broadcast %cst_12 : f32 to vector<8x8xf32>
    %26 = arith.subf %25, %24 : vector<8x8xf32>
    %27 = arith.mulf %26, %5 : vector<8x8xf32>
    %28 = arith.truncf %27 : vector<8x8xf32> to vector<8x8xbf16>
    %29 = arith.truncf %21 : vector<8x8xf32> to vector<8x8xbf16>
    %cst_13 = arith.constant dense<0.000000e+00> : vector<8x8xf32>
    %30 = tpu.matmul %28, %29, %cst_13 {dimension_numbers = #tpu.dot_dimension_numbers<[1], [0], [0], [1], [0, 0, 1, 1], [], []>} : vector<8x8xbf16>, vector<8x8xbf16>, vector<8x8xf32> -> vector<8x8xf32>
    %31 = arith.addf %21, %30 : vector<8x8xf32>
    %32 = arith.truncf %27 : vector<8x8xf32> to vector<8x8xbf16>
    %33 = arith.truncf %27 : vector<8x8xf32> to vector<8x8xbf16>
    %cst_14 = arith.constant dense<0.000000e+00> : vector<8x8xf32>
    %34 = tpu.matmul %32, %33, %cst_14 {dimension_numbers = #tpu.dot_dimension_numbers<[1], [0], [0], [1], [0, 0, 1, 1], [], []>} : vector<8x8xbf16>, vector<8x8xbf16>, vector<8x8xf32> -> vector<8x8xf32>
    %35 = arith.truncf %34 : vector<8x8xf32> to vector<8x8xbf16>
    %36 = arith.truncf %31 : vector<8x8xf32> to vector<8x8xbf16>
    %cst_15 = arith.constant dense<0.000000e+00> : vector<8x8xf32>
    %37 = tpu.matmul %35, %36, %cst_15 {dimension_numbers = #tpu.dot_dimension_numbers<[1], [0], [0], [1], [0, 0, 1, 1], [], []>} : vector<8x8xbf16>, vector<8x8xbf16>, vector<8x8xf32> -> vector<8x8xf32>
    %38 = arith.addf %31, %37 : vector<8x8xf32>
    %39 = arith.truncf %34 : vector<8x8xf32> to vector<8x8xbf16>
    %40 = arith.truncf %34 : vector<8x8xf32> to vector<8x8xbf16>
    %cst_16 = arith.constant dense<0.000000e+00> : vector<8x8xf32>
    %41 = tpu.matmul %39, %40, %cst_16 {dimension_numbers = #tpu.dot_dimension_numbers<[1], [0], [0], [1], [0, 0, 1, 1], [], []>} : vector<8x8xbf16>, vector<8x8xbf16>, vector<8x8xf32> -> vector<8x8xf32>
    %42 = arith.truncf %41 : vector<8x8xf32> to vector<8x8xbf16>
    %43 = arith.truncf %38 : vector<8x8xf32> to vector<8x8xbf16>
    %cst_17 = arith.constant dense<0.000000e+00> : vector<8x8xf32>
    %44 = tpu.matmul %42, %43, %cst_17 {dimension_numbers = #tpu.dot_dimension_numbers<[1], [0], [0], [1], [0, 0, 1, 1], [], []>} : vector<8x8xbf16>, vector<8x8xbf16>, vector<8x8xf32> -> vector<8x8xf32>
    %45 = arith.addf %38, %44 : vector<8x8xf32>
    %c0_18 = arith.constant 0 : index
    %c0_19 = arith.constant 0 : index
    %46 = vector.load %arg10[%c0_18, %c0_19] : memref<8x8xf32, #tpu.memory_space<vmem>>, vector<8x8xf32>
    tpu.vector_store %arg10[%c0_18, %c0_19], %45 {strides = array<i32>} : memref<8x8xf32, #tpu.memory_space<vmem>>, vector<8x8xf32>,
    %c0_20 = arith.constant 0 : index
    %c0_21 = arith.constant 0 : index
    %47 = vector.load %arg10[%c0_20, %c0_21] : memref<8x8xf32, #tpu.memory_space<vmem>>, vector<8x8xf32>
    %cst_22 = arith.constant dense<0.000000e+00> : vector<8x8xf32>
    %48 = tpu.matmul %7, %8, %cst_22 {dimension_numbers = #tpu.dot_dimension_numbers<[1], [1], [0], [0], [0, 0, 1, 0], [], []>} : vector<8x8xbf16>, vector<8x8xbf16>, vector<8x8xf32> -> vector<8x8xf32>
    %49 = arith.mulf %48, %6 : vector<8x8xf32>
    %50 = arith.truncf %49 : vector<8x8xf32> to vector<8x8xbf16>
    %51 = arith.truncf %47 : vector<8x8xf32> to vector<8x8xbf16>
    %cst_23 = arith.constant dense<0.000000e+00> : vector<8x8xf32>
    %52 = tpu.matmul %50, %51, %cst_23 {dimension_numbers = #tpu.dot_dimension_numbers<[1], [0], [0], [1], [0, 0, 1, 1], [], []>} : vector<8x8xbf16>, vector<8x8xbf16>, vector<8x8xf32> -> vector<8x8xf32>
    %53 = arith.addf %19, %52 : vector<8x8xf32>
    %c0_24 = arith.constant 0 : index
    %c0_25 = arith.constant 0 : index
    %54 = vector.load %arg9[%c0_24, %c0_25] : memref<8x32xf32, #tpu.memory_space<vmem>>, vector<8x8xf32>
    tpu.vector_store %arg9[%c0_24, %c0_25], %53 {strides = array<i32>} : memref<8x32xf32, #tpu.memory_space<vmem>>, vector<8x8xf32>,
    %55 = arith.truncf %47 : vector<8x8xf32> to vector<8x8xbf16>
    %cst_26 = arith.constant dense<0.000000e+00> : vector<8x8xf32>
    %56 = tpu.matmul %8, %55, %cst_26 {dimension_numbers = #tpu.dot_dimension_numbers<[0], [0], [1], [1], [0, 1, 1, 1], [], []>} : vector<8x8xbf16>, vector<8x8xbf16>, vector<8x8xf32> -> vector<8x8xf32>
    %57 = arith.addf %15, %56 : vector<8x8xf32>
    %c0_27 = arith.constant 0 : index
    %c0_28 = arith.constant 0 : index
    %c0_29 = arith.constant 0 : index
    %58 = vector.load %arg8[%c0_27, %c0_28, %c0_29] : memref<4x8x8xf32, #tpu.memory_space<vmem>>, vector<1x8x8xf32>
    %59 = vector.shape_cast %58 : vector<1x8x8xf32> to vector<8x8xf32>
    %60 = vector.shape_cast %57 : vector<8x8xf32> to vector<1x8x8xf32>
    tpu.vector_store %arg8[%c0_27, %c0_28, %c0_29], %60 {strides = array<i32>} : memref<4x8x8xf32, #tpu.memory_space<vmem>>, vector<1x8x8xf32>,
    %61 = vector.extract_strided_slice %4 {offsets = [0, 8], sizes = [8, 8], strides = [1, 1]} : vector<8x128xbf16> to vector<8x8xbf16>
    %62 = vector.extract_strided_slice %4 {offsets = [0, 40], sizes = [8, 8], strides = [1, 1]} : vector<8x128xbf16> to vector<8x8xbf16>
    %63 = vector.extract_strided_slice %4 {offsets = [0, 72], sizes = [8, 8], strides = [1, 1]} : vector<8x128xbf16> to vector<8x8xbf16>
    %64 = arith.extf %63 : vector<8x8xbf16> to vector<8x8xf32>
    %65 = vector.extract_strided_slice %4 {offsets = [0, 104], sizes = [8, 8], strides = [1, 1]} : vector<8x128xbf16> to vector<8x8xbf16>
    %66 = arith.extf %65 : vector<8x8xbf16> to vector<8x8xf32>
    %67 = vector.extract_strided_slice %66 {offsets = [0, 0], sizes = [8, 1], strides = [1, 1]} : vector<8x8xf32> to vector<8x1xf32>
    %c1 = arith.constant 1 : index
    %c0_30 = arith.constant 0 : index
    %c0_31 = arith.constant 0 : index
    %68 = vector.load %arg8[%c1, %c0_30, %c0_31] : memref<4x8x8xf32, #tpu.memory_space<vmem>>, vector<1x8x8xf32>
    %69 = vector.shape_cast %68 : vector<1x8x8xf32> to vector<8x8xf32>
    %70 = arith.truncf %69 : vector<8x8xf32> to vector<8x8xbf16>
    %cst_32 = arith.constant dense<0.000000e+00> : vector<8x8xf32>
    %71 = tpu.matmul %62, %70, %cst_32 {dimension_numbers = #tpu.dot_dimension_numbers<[1], [0], [0], [1], [0, 0, 1, 1], [], []>} : vector<8x8xbf16>, vector<8x8xbf16>, vector<8x8xf32> -> vector<8x8xf32>
    %72 = arith.truncf %69 : vector<8x8xf32> to vector<8x8xbf16>
    %cst_33 = arith.constant dense<0.000000e+00> : vector<8x8xf32>
    %73 = tpu.matmul %61, %72, %cst_33 {dimension_numbers = #tpu.dot_dimension_numbers<[1], [0], [0], [1], [0, 0, 1, 1], [], []>} : vector<8x8xbf16>, vector<8x8xbf16>, vector<8x8xf32> -> vector<8x8xf32>
    %74 = arith.subf %64, %71 : vector<8x8xf32>
    %75 = arith.mulf %66, %74 : vector<8x8xf32>
    %cst_34 = arith.constant dense<0.000000e+00> : vector<8x8xf32>
    %76 = tpu.matmul %62, %62, %cst_34 {dimension_numbers = #tpu.dot_dimension_numbers<[1], [1], [0], [0], [0, 0, 1, 0], [], []>} : vector<8x8xbf16>, vector<8x8xbf16>, vector<8x8xf32> -> vector<8x8xf32>
    %77 = vector.broadcast %67 : vector<8x1xf32> to vector<8x8xf32>
    %78 = arith.mulf %77, %76 : vector<8x8xf32>
    %cst_35 = arith.constant 0.000000e+00 : f32
    %79 = vector.broadcast %cst_35 : f32 to vector<8x8xf32>
    %80 = arith.subf %79, %78 : vector<8x8xf32>
    %81 = arith.mulf %80, %5 : vector<8x8xf32>
    %82 = arith.truncf %81 : vector<8x8xf32> to vector<8x8xbf16>
    %83 = arith.truncf %75 : vector<8x8xf32> to vector<8x8xbf16>
    %cst_36 = arith.constant dense<0.000000e+00> : vector<8x8xf32>
    %84 = tpu.matmul %82, %83, %cst_36 {dimension_numbers = #tpu.dot_dimension_numbers<[1], [0], [0], [1], [0, 0, 1, 1], [], []>} : vector<8x8xbf16>, vector<8x8xbf16>, vector<8x8xf32> -> vector<8x8xf32>
    %85 = arith.addf %75, %84 : vector<8x8xf32>
    %86 = arith.truncf %81 : vector<8x8xf32> to vector<8x8xbf16>
    %87 = arith.truncf %81 : vector<8x8xf32> to vector<8x8xbf16>
    %cst_37 = arith.constant dense<0.000000e+00> : vector<8x8xf32>
    %88 = tpu.matmul %86, %87, %cst_37 {dimension_numbers = #tpu.dot_dimension_numbers<[1], [0], [0], [1], [0, 0, 1, 1], [], []>} : vector<8x8xbf16>, vector<8x8xbf16>, vector<8x8xf32> -> vector<8x8xf32>
    %89 = arith.truncf %88 : vector<8x8xf32> to vector<8x8xbf16>
    %90 = arith.truncf %85 : vector<8x8xf32> to vector<8x8xbf16>
    %cst_38 = arith.constant dense<0.000000e+00> : vector<8x8xf32>
    %91 = tpu.matmul %89, %90, %cst_38 {dimension_numbers = #tpu.dot_dimension_numbers<[1], [0], [0], [1], [0, 0, 1, 1], [], []>} : vector<8x8xbf16>, vector<8x8xbf16>, vector<8x8xf32> -> vector<8x8xf32>
    %92 = arith.addf %85, %91 : vector<8x8xf32>
    %93 = arith.truncf %88 : vector<8x8xf32> to vector<8x8xbf16>
    %94 = arith.truncf %88 : vector<8x8xf32> to vector<8x8xbf16>
    %cst_39 = arith.constant dense<0.000000e+00> : vector<8x8xf32>
    %95 = tpu.matmul %93, %94, %cst_39 {dimension_numbers = #tpu.dot_dimension_numbers<[1], [0], [0], [1], [0, 0, 1, 1], [], []>} : vector<8x8xbf16>, vector<8x8xbf16>, vector<8x8xf32> -> vector<8x8xf32>
    %96 = arith.truncf %95 : vector<8x8xf32> to vector<8x8xbf16>
    %97 = arith.truncf %92 : vector<8x8xf32> to vector<8x8xbf16>
    %cst_40 = arith.constant dense<0.000000e+00> : vector<8x8xf32>
    %98 = tpu.matmul %96, %97, %cst_40 {dimension_numbers = #tpu.dot_dimension_numbers<[1], [0], [0], [1], [0, 0, 1, 1], [], []>} : vector<8x8xbf16>, vector<8x8xbf16>, vector<8x8xf32> -> vector<8x8xf32>
    %99 = arith.addf %92, %98 : vector<8x8xf32>
    %c0_41 = arith.constant 0 : index
    %c0_42 = arith.constant 0 : index
    %100 = vector.load %arg10[%c0_41, %c0_42] : memref<8x8xf32, #tpu.memory_space<vmem>>, vector<8x8xf32>
    tpu.vector_store %arg10[%c0_41, %c0_42], %99 {strides = array<i32>} : memref<8x8xf32, #tpu.memory_space<vmem>>, vector<8x8xf32>,
    %c0_43 = arith.constant 0 : index
    %c0_44 = arith.constant 0 : index
    %101 = vector.load %arg10[%c0_43, %c0_44] : memref<8x8xf32, #tpu.memory_space<vmem>>, vector<8x8xf32>
    %cst_45 = arith.constant dense<0.000000e+00> : vector<8x8xf32>
    %102 = tpu.matmul %61, %62, %cst_45 {dimension_numbers = #tpu.dot_dimension_numbers<[1], [1], [0], [0], [0, 0, 1, 0], [], []>} : vector<8x8xbf16>, vector<8x8xbf16>, vector<8x8xf32> -> vector<8x8xf32>
    %103 = arith.mulf %102, %6 : vector<8x8xf32>
    %104 = arith.truncf %103 : vector<8x8xf32> to vector<8x8xbf16>
    %105 = arith.truncf %101 : vector<8x8xf32> to vector<8x8xbf16>
    %cst_46 = arith.constant dense<0.000000e+00> : vector<8x8xf32>
    %106 = tpu.matmul %104, %105, %cst_46 {dimension_numbers = #tpu.dot_dimension_numbers<[1], [0], [0], [1], [0, 0, 1, 1], [], []>} : vector<8x8xbf16>, vector<8x8xbf16>, vector<8x8xf32> -> vector<8x8xf32>
    %107 = arith.addf %73, %106 : vector<8x8xf32>
    %c0_47 = arith.constant 0 : index
    %c8 = arith.constant 8 : index
    %108 = vector.load %arg9[%c0_47, %c8] : memref<8x32xf32, #tpu.memory_space<vmem>>, vector<8x8xf32>
    tpu.vector_store %arg9[%c0_47, %c8], %107 {strides = array<i32>} : memref<8x32xf32, #tpu.memory_space<vmem>>, vector<8x8xf32>,
    %109 = arith.truncf %101 : vector<8x8xf32> to vector<8x8xbf16>
    %cst_48 = arith.constant dense<0.000000e+00> : vector<8x8xf32>
    %110 = tpu.matmul %62, %109, %cst_48 {dimension_numbers = #tpu.dot_dimension_numbers<[0], [0], [1], [1], [0, 1, 1, 1], [], []>} : vector<8x8xbf16>, vector<8x8xbf16>, vector<8x8xf32> -> vector<8x8xf32>
    %111 = arith.addf %69, %110 : vector<8x8xf32>
    %c1_49 = arith.constant 1 : index
    %c0_50 = arith.constant 0 : index
    %c0_51 = arith.constant 0 : index
    %112 = vector.load %arg8[%c1_49, %c0_50, %c0_51] : memref<4x8x8xf32, #tpu.memory_space<vmem>>, vector<1x8x8xf32>
    %113 = vector.shape_cast %112 : vector<1x8x8xf32> to vector<8x8xf32>
    %114 = vector.shape_cast %111 : vector<8x8xf32> to vector<1x8x8xf32>
    tpu.vector_store %arg8[%c1_49, %c0_50, %c0_51], %114 {strides = array<i32>} : memref<4x8x8xf32, #tpu.memory_space<vmem>>, vector<1x8x8xf32>,
    %115 = vector.extract_strided_slice %4 {offsets = [0, 16], sizes = [8, 8], strides = [1, 1]} : vector<8x128xbf16> to vector<8x8xbf16>
    %116 = vector.extract_strided_slice %4 {offsets = [0, 48], sizes = [8, 8], strides = [1, 1]} : vector<8x128xbf16> to vector<8x8xbf16>
    %117 = vector.extract_strided_slice %4 {offsets = [0, 80], sizes = [8, 8], strides = [1, 1]} : vector<8x128xbf16> to vector<8x8xbf16>
    %118 = arith.extf %117 : vector<8x8xbf16> to vector<8x8xf32>
    %119 = vector.extract_strided_slice %4 {offsets = [0, 112], sizes = [8, 8], strides = [1, 1]} : vector<8x128xbf16> to vector<8x8xbf16>
    %120 = arith.extf %119 : vector<8x8xbf16> to vector<8x8xf32>
    %121 = vector.extract_strided_slice %120 {offsets = [0, 0], sizes = [8, 1], strides = [1, 1]} : vector<8x8xf32> to vector<8x1xf32>
    %c2 = arith.constant 2 : index
    %c0_52 = arith.constant 0 : index
    %c0_53 = arith.constant 0 : index
    %122 = vector.load %arg8[%c2, %c0_52, %c0_53] : memref<4x8x8xf32, #tpu.memory_space<vmem>>, vector<1x8x8xf32>
    %123 = vector.shape_cast %122 : vector<1x8x8xf32> to vector<8x8xf32>
    %124 = arith.truncf %123 : vector<8x8xf32> to vector<8x8xbf16>
    %cst_54 = arith.constant dense<0.000000e+00> : vector<8x8xf32>
    %125 = tpu.matmul %116, %124, %cst_54 {dimension_numbers = #tpu.dot_dimension_numbers<[1], [0], [0], [1], [0, 0, 1, 1], [], []>} : vector<8x8xbf16>, vector<8x8xbf16>, vector<8x8xf32> -> vector<8x8xf32>
    %126 = arith.truncf %123 : vector<8x8xf32> to vector<8x8xbf16>
    %cst_55 = arith.constant dense<0.000000e+00> : vector<8x8xf32>
    %127 = tpu.matmul %115, %126, %cst_55 {dimension_numbers = #tpu.dot_dimension_numbers<[1], [0], [0], [1], [0, 0, 1, 1], [], []>} : vector<8x8xbf16>, vector<8x8xbf16>, vector<8x8xf32> -> vector<8x8xf32>
    %128 = arith.subf %118, %125 : vector<8x8xf32>
    %129 = arith.mulf %120, %128 : vector<8x8xf32>
    %cst_56 = arith.constant dense<0.000000e+00> : vector<8x8xf32>
    %130 = tpu.matmul %116, %116, %cst_56 {dimension_numbers = #tpu.dot_dimension_numbers<[1], [1], [0], [0], [0, 0, 1, 0], [], []>} : vector<8x8xbf16>, vector<8x8xbf16>, vector<8x8xf32> -> vector<8x8xf32>
    %131 = vector.broadcast %121 : vector<8x1xf32> to vector<8x8xf32>
    %132 = arith.mulf %131, %130 : vector<8x8xf32>
    %cst_57 = arith.constant 0.000000e+00 : f32
    %133 = vector.broadcast %cst_57 : f32 to vector<8x8xf32>
    %134 = arith.subf %133, %132 : vector<8x8xf32>
    %135 = arith.mulf %134, %5 : vector<8x8xf32>
    %136 = arith.truncf %135 : vector<8x8xf32> to vector<8x8xbf16>
    %137 = arith.truncf %129 : vector<8x8xf32> to vector<8x8xbf16>
    %cst_58 = arith.constant dense<0.000000e+00> : vector<8x8xf32>
    %138 = tpu.matmul %136, %137, %cst_58 {dimension_numbers = #tpu.dot_dimension_numbers<[1], [0], [0], [1], [0, 0, 1, 1], [], []>} : vector<8x8xbf16>, vector<8x8xbf16>, vector<8x8xf32> -> vector<8x8xf32>
    %139 = arith.addf %129, %138 : vector<8x8xf32>
    %140 = arith.truncf %135 : vector<8x8xf32> to vector<8x8xbf16>
    %141 = arith.truncf %135 : vector<8x8xf32> to vector<8x8xbf16>
    %cst_59 = arith.constant dense<0.000000e+00> : vector<8x8xf32>
    %142 = tpu.matmul %140, %141, %cst_59 {dimension_numbers = #tpu.dot_dimension_numbers<[1], [0], [0], [1], [0, 0, 1, 1], [], []>} : vector<8x8xbf16>, vector<8x8xbf16>, vector<8x8xf32> -> vector<8x8xf32>
    %143 = arith.truncf %142 : vector<8x8xf32> to vector<8x8xbf16>
    %144 = arith.truncf %139 : vector<8x8xf32> to vector<8x8xbf16>
    %cst_60 = arith.constant dense<0.000000e+00> : vector<8x8xf32>
    %145 = tpu.matmul %143, %144, %cst_60 {dimension_numbers = #tpu.dot_dimension_numbers<[1], [0], [0], [1], [0, 0, 1, 1], [], []>} : vector<8x8xbf16>, vector<8x8xbf16>, vector<8x8xf32> -> vector<8x8xf32>
    %146 = arith.addf %139, %145 : vector<8x8xf32>
    %147 = arith.truncf %142 : vector<8x8xf32> to vector<8x8xbf16>
    %148 = arith.truncf %142 : vector<8x8xf32> to vector<8x8xbf16>
    %cst_61 = arith.constant dense<0.000000e+00> : vector<8x8xf32>
    %149 = tpu.matmul %147, %148, %cst_61 {dimension_numbers = #tpu.dot_dimension_numbers<[1], [0], [0], [1], [0, 0, 1, 1], [], []>} : vector<8x8xbf16>, vector<8x8xbf16>, vector<8x8xf32> -> vector<8x8xf32>
    %150 = arith.truncf %149 : vector<8x8xf32> to vector<8x8xbf16>
    %151 = arith.truncf %146 : vector<8x8xf32> to vector<8x8xbf16>
    %cst_62 = arith.constant dense<0.000000e+00> : vector<8x8xf32>
    %152 = tpu.matmul %150, %151, %cst_62 {dimension_numbers = #tpu.dot_dimension_numbers<[1], [0], [0], [1], [0, 0, 1, 1], [], []>} : vector<8x8xbf16>, vector<8x8xbf16>, vector<8x8xf32> -> vector<8x8xf32>
    %153 = arith.addf %146, %152 : vector<8x8xf32>
    %c0_63 = arith.constant 0 : index
    %c0_64 = arith.constant 0 : index
    %154 = vector.load %arg10[%c0_63, %c0_64] : memref<8x8xf32, #tpu.memory_space<vmem>>, vector<8x8xf32>
    tpu.vector_store %arg10[%c0_63, %c0_64], %153 {strides = array<i32>} : memref<8x8xf32, #tpu.memory_space<vmem>>, vector<8x8xf32>,
    %c0_65 = arith.constant 0 : index
    %c0_66 = arith.constant 0 : index
    %155 = vector.load %arg10[%c0_65, %c0_66] : memref<8x8xf32, #tpu.memory_space<vmem>>, vector<8x8xf32>
    %cst_67 = arith.constant dense<0.000000e+00> : vector<8x8xf32>
    %156 = tpu.matmul %115, %116, %cst_67 {dimension_numbers = #tpu.dot_dimension_numbers<[1], [1], [0], [0], [0, 0, 1, 0], [], []>} : vector<8x8xbf16>, vector<8x8xbf16>, vector<8x8xf32> -> vector<8x8xf32>
    %157 = arith.mulf %156, %6 : vector<8x8xf32>
    %158 = arith.truncf %157 : vector<8x8xf32> to vector<8x8xbf16>
    %159 = arith.truncf %155 : vector<8x8xf32> to vector<8x8xbf16>
    %cst_68 = arith.constant dense<0.000000e+00> : vector<8x8xf32>
    %160 = tpu.matmul %158, %159, %cst_68 {dimension_numbers = #tpu.dot_dimension_numbers<[1], [0], [0], [1], [0, 0, 1, 1], [], []>} : vector<8x8xbf16>, vector<8x8xbf16>, vector<8x8xf32> -> vector<8x8xf32>
    %161 = arith.addf %127, %160 : vector<8x8xf32>
    %c0_69 = arith.constant 0 : index
    %c16 = arith.constant 16 : index
    %162 = vector.load %arg9[%c0_69, %c16] : memref<8x32xf32, #tpu.memory_space<vmem>>, vector<8x8xf32>
    tpu.vector_store %arg9[%c0_69, %c16], %161 {strides = array<i32>} : memref<8x32xf32, #tpu.memory_space<vmem>>, vector<8x8xf32>,
    %163 = arith.truncf %155 : vector<8x8xf32> to vector<8x8xbf16>
    %cst_70 = arith.constant dense<0.000000e+00> : vector<8x8xf32>
    %164 = tpu.matmul %116, %163, %cst_70 {dimension_numbers = #tpu.dot_dimension_numbers<[0], [0], [1], [1], [0, 1, 1, 1], [], []>} : vector<8x8xbf16>, vector<8x8xbf16>, vector<8x8xf32> -> vector<8x8xf32>
    %165 = arith.addf %123, %164 : vector<8x8xf32>
    %c2_71 = arith.constant 2 : index
    %c0_72 = arith.constant 0 : index
    %c0_73 = arith.constant 0 : index
    %166 = vector.load %arg8[%c2_71, %c0_72, %c0_73] : memref<4x8x8xf32, #tpu.memory_space<vmem>>, vector<1x8x8xf32>
    %167 = vector.shape_cast %166 : vector<1x8x8xf32> to vector<8x8xf32>
    %168 = vector.shape_cast %165 : vector<8x8xf32> to vector<1x8x8xf32>
    tpu.vector_store %arg8[%c2_71, %c0_72, %c0_73], %168 {strides = array<i32>} : memref<4x8x8xf32, #tpu.memory_space<vmem>>, vector<1x8x8xf32>,
    %169 = vector.extract_strided_slice %4 {offsets = [0, 24], sizes = [8, 8], strides = [1, 1]} : vector<8x128xbf16> to vector<8x8xbf16>
    %170 = vector.extract_strided_slice %4 {offsets = [0, 56], sizes = [8, 8], strides = [1, 1]} : vector<8x128xbf16> to vector<8x8xbf16>
    %171 = vector.extract_strided_slice %4 {offsets = [0, 88], sizes = [8, 8], strides = [1, 1]} : vector<8x128xbf16> to vector<8x8xbf16>
    %172 = arith.extf %171 : vector<8x8xbf16> to vector<8x8xf32>
    %173 = vector.extract_strided_slice %4 {offsets = [0, 120], sizes = [8, 8], strides = [1, 1]} : vector<8x128xbf16> to vector<8x8xbf16>
    %174 = arith.extf %173 : vector<8x8xbf16> to vector<8x8xf32>
    %175 = vector.extract_strided_slice %174 {offsets = [0, 0], sizes = [8, 1], strides = [1, 1]} : vector<8x8xf32> to vector<8x1xf32>
    %c3 = arith.constant 3 : index
    %c0_74 = arith.constant 0 : index
    %c0_75 = arith.constant 0 : index
    %176 = vector.load %arg8[%c3, %c0_74, %c0_75] : memref<4x8x8xf32, #tpu.memory_space<vmem>>, vector<1x8x8xf32>
    %177 = vector.shape_cast %176 : vector<1x8x8xf32> to vector<8x8xf32>
    %178 = arith.truncf %177 : vector<8x8xf32> to vector<8x8xbf16>
    %cst_76 = arith.constant dense<0.000000e+00> : vector<8x8xf32>
    %179 = tpu.matmul %170, %178, %cst_76 {dimension_numbers = #tpu.dot_dimension_numbers<[1], [0], [0], [1], [0, 0, 1, 1], [], []>} : vector<8x8xbf16>, vector<8x8xbf16>, vector<8x8xf32> -> vector<8x8xf32>
    %180 = arith.truncf %177 : vector<8x8xf32> to vector<8x8xbf16>
    %cst_77 = arith.constant dense<0.000000e+00> : vector<8x8xf32>
    %181 = tpu.matmul %169, %180, %cst_77 {dimension_numbers = #tpu.dot_dimension_numbers<[1], [0], [0], [1], [0, 0, 1, 1], [], []>} : vector<8x8xbf16>, vector<8x8xbf16>, vector<8x8xf32> -> vector<8x8xf32>
    %182 = arith.subf %172, %179 : vector<8x8xf32>
    %183 = arith.mulf %174, %182 : vector<8x8xf32>
    %cst_78 = arith.constant dense<0.000000e+00> : vector<8x8xf32>
    %184 = tpu.matmul %170, %170, %cst_78 {dimension_numbers = #tpu.dot_dimension_numbers<[1], [1], [0], [0], [0, 0, 1, 0], [], []>} : vector<8x8xbf16>, vector<8x8xbf16>, vector<8x8xf32> -> vector<8x8xf32>
    %185 = vector.broadcast %175 : vector<8x1xf32> to vector<8x8xf32>
    %186 = arith.mulf %185, %184 : vector<8x8xf32>
    %cst_79 = arith.constant 0.000000e+00 : f32
    %187 = vector.broadcast %cst_79 : f32 to vector<8x8xf32>
    %188 = arith.subf %187, %186 : vector<8x8xf32>
    %189 = arith.mulf %188, %5 : vector<8x8xf32>
    %190 = arith.truncf %189 : vector<8x8xf32> to vector<8x8xbf16>
    %191 = arith.truncf %183 : vector<8x8xf32> to vector<8x8xbf16>
    %cst_80 = arith.constant dense<0.000000e+00> : vector<8x8xf32>
    %192 = tpu.matmul %190, %191, %cst_80 {dimension_numbers = #tpu.dot_dimension_numbers<[1], [0], [0], [1], [0, 0, 1, 1], [], []>} : vector<8x8xbf16>, vector<8x8xbf16>, vector<8x8xf32> -> vector<8x8xf32>
    %193 = arith.addf %183, %192 : vector<8x8xf32>
    %194 = arith.truncf %189 : vector<8x8xf32> to vector<8x8xbf16>
    %195 = arith.truncf %189 : vector<8x8xf32> to vector<8x8xbf16>
    %cst_81 = arith.constant dense<0.000000e+00> : vector<8x8xf32>
    %196 = tpu.matmul %194, %195, %cst_81 {dimension_numbers = #tpu.dot_dimension_numbers<[1], [0], [0], [1], [0, 0, 1, 1], [], []>} : vector<8x8xbf16>, vector<8x8xbf16>, vector<8x8xf32> -> vector<8x8xf32>
    %197 = arith.truncf %196 : vector<8x8xf32> to vector<8x8xbf16>
    %198 = arith.truncf %193 : vector<8x8xf32> to vector<8x8xbf16>
    %cst_82 = arith.constant dense<0.000000e+00> : vector<8x8xf32>
    %199 = tpu.matmul %197, %198, %cst_82 {dimension_numbers = #tpu.dot_dimension_numbers<[1], [0], [0], [1], [0, 0, 1, 1], [], []>} : vector<8x8xbf16>, vector<8x8xbf16>, vector<8x8xf32> -> vector<8x8xf32>
    %200 = arith.addf %193, %199 : vector<8x8xf32>
    %201 = arith.truncf %196 : vector<8x8xf32> to vector<8x8xbf16>
    %202 = arith.truncf %196 : vector<8x8xf32> to vector<8x8xbf16>
    %cst_83 = arith.constant dense<0.000000e+00> : vector<8x8xf32>
    %203 = tpu.matmul %201, %202, %cst_83 {dimension_numbers = #tpu.dot_dimension_numbers<[1], [0], [0], [1], [0, 0, 1, 1], [], []>} : vector<8x8xbf16>, vector<8x8xbf16>, vector<8x8xf32> -> vector<8x8xf32>
    %204 = arith.truncf %203 : vector<8x8xf32> to vector<8x8xbf16>
    %205 = arith.truncf %200 : vector<8x8xf32> to vector<8x8xbf16>
    %cst_84 = arith.constant dense<0.000000e+00> : vector<8x8xf32>
    %206 = tpu.matmul %204, %205, %cst_84 {dimension_numbers = #tpu.dot_dimension_numbers<[1], [0], [0], [1], [0, 0, 1, 1], [], []>} : vector<8x8xbf16>, vector<8x8xbf16>, vector<8x8xf32> -> vector<8x8xf32>
    %207 = arith.addf %200, %206 : vector<8x8xf32>
    %c0_85 = arith.constant 0 : index
    %c0_86 = arith.constant 0 : index
    %208 = vector.load %arg10[%c0_85, %c0_86] : memref<8x8xf32, #tpu.memory_space<vmem>>, vector<8x8xf32>
    tpu.vector_store %arg10[%c0_85, %c0_86], %207 {strides = array<i32>} : memref<8x8xf32, #tpu.memory_space<vmem>>, vector<8x8xf32>,
    %c0_87 = arith.constant 0 : index
    %c0_88 = arith.constant 0 : index
    %209 = vector.load %arg10[%c0_87, %c0_88] : memref<8x8xf32, #tpu.memory_space<vmem>>, vector<8x8xf32>
    %cst_89 = arith.constant dense<0.000000e+00> : vector<8x8xf32>
    %210 = tpu.matmul %169, %170, %cst_89 {dimension_numbers = #tpu.dot_dimension_numbers<[1], [1], [0], [0], [0, 0, 1, 0], [], []>} : vector<8x8xbf16>, vector<8x8xbf16>, vector<8x8xf32> -> vector<8x8xf32>
    %211 = arith.mulf %210, %6 : vector<8x8xf32>
    %212 = arith.truncf %211 : vector<8x8xf32> to vector<8x8xbf16>
    %213 = arith.truncf %209 : vector<8x8xf32> to vector<8x8xbf16>
    %cst_90 = arith.constant dense<0.000000e+00> : vector<8x8xf32>
    %214 = tpu.matmul %212, %213, %cst_90 {dimension_numbers = #tpu.dot_dimension_numbers<[1], [0], [0], [1], [0, 0, 1, 1], [], []>} : vector<8x8xbf16>, vector<8x8xbf16>, vector<8x8xf32> -> vector<8x8xf32>
    %215 = arith.addf %181, %214 : vector<8x8xf32>
    %c0_91 = arith.constant 0 : index
    %c24 = arith.constant 24 : index
    %216 = vector.load %arg9[%c0_91, %c24] : memref<8x32xf32, #tpu.memory_space<vmem>>, vector<8x8xf32>
    tpu.vector_store %arg9[%c0_91, %c24], %215 {strides = array<i32>} : memref<8x32xf32, #tpu.memory_space<vmem>>, vector<8x8xf32>,
    %217 = arith.truncf %209 : vector<8x8xf32> to vector<8x8xbf16>
    %cst_92 = arith.constant dense<0.000000e+00> : vector<8x8xf32>
    %218 = tpu.matmul %170, %217, %cst_92 {dimension_numbers = #tpu.dot_dimension_numbers<[0], [0], [1], [1], [0, 1, 1, 1], [], []>} : vector<8x8xbf16>, vector<8x8xbf16>, vector<8x8xf32> -> vector<8x8xf32>
    %219 = arith.addf %177, %218 : vector<8x8xf32>
    %c3_93 = arith.constant 3 : index
    %c0_94 = arith.constant 0 : index
    %c0_95 = arith.constant 0 : index
    %220 = vector.load %arg8[%c3_93, %c0_94, %c0_95] : memref<4x8x8xf32, #tpu.memory_space<vmem>>, vector<1x8x8xf32>
    %221 = vector.shape_cast %220 : vector<1x8x8xf32> to vector<8x8xf32>
    %222 = vector.shape_cast %219 : vector<8x8xf32> to vector<1x8x8xf32>
    tpu.vector_store %arg8[%c3_93, %c0_94, %c0_95], %222 {strides = array<i32>} : memref<4x8x8xf32, #tpu.memory_space<vmem>>, vector<1x8x8xf32>,
    %c0_96 = arith.constant 0 : index
    %c0_97 = arith.constant 0 : index
    %c0_98 = arith.constant 0 : index
    %223 = vector.load %arg3[%c0_96, %c0_97, %c0_98] : memref<1x8x32xf32, #tpu.memory_space<vmem>>, vector<1x8x32xf32>
    %224 = vector.shape_cast %223 : vector<1x8x32xf32> to vector<8x32xf32>
    %c0_99 = arith.constant 0 : index
    %c0_100 = arith.constant 0 : index
    %225 = vector.load %arg9[%c0_99, %c0_100] : memref<8x32xf32, #tpu.memory_space<vmem>>, vector<8x32xf32>
    %226 = arith.truncf %225 : vector<8x32xf32> to vector<8x32xbf16>
    %c0_101 = arith.constant 0 : index
    %c0_102 = arith.constant 0 : index
    %227 = vector.load %arg6[%c0_101, %c0_102] : memref<32x32xbf16, #tpu.memory_space<vmem>>, vector<32x32xbf16>
    %cst_103 = arith.constant dense<0.000000e+00> : vector<8x32xf32>
    %228 = tpu.matmul %226, %227, %cst_103 {dimension_numbers = #tpu.dot_dimension_numbers<[1], [0], [0], [1], [0, 0, 1, 1], [], []>} : vector<8x32xbf16>, vector<32x32xbf16>, vector<8x32xf32> -> vector<8x32xf32>
    %229 = arith.addf %224, %228 : vector<8x32xf32>
    %c0_104 = arith.constant 0 : index
    %c0_105 = arith.constant 0 : index
    %c0_106 = arith.constant 0 : index
    %230 = vector.load %arg7[%c0_104, %c0_105, %c0_106] : memref<1x8x32xf32, #tpu.memory_space<vmem>>, vector<1x8x32xf32>
    %231 = vector.shape_cast %230 : vector<1x8x32xf32> to vector<8x32xf32>
    %232 = vector.shape_cast %229 : vector<8x32xf32> to vector<1x8x32xf32>
    tpu.vector_store %arg7[%c0_104, %c0_105, %c0_106], %232 {strides = array<i32>} : memref<1x8x32xf32, #tpu.memory_space<vmem>>, vector<1x8x32xf32>,
    return
  }
  func.func @transform_0(%arg0: i32, %arg1: i32) -> (i32, i32, i32) {
    %c0_i32 = arith.constant 0 : i32
    %c0_i32_0 = arith.constant 0 : i32
    return %arg0, %arg1, %c0_i32 : i32, i32, i32
  }
  func.func @transform_1(%arg0: i32, %arg1: i32) -> (i32, i32, i32) {
    %c0_i32 = arith.constant 0 : i32
    %c0_i32_0 = arith.constant 0 : i32
    return %arg0, %arg1, %c0_i32 : i32, i32, i32
  }
  func.func @transform_2(%arg0: i32, %arg1: i32) -> (i32, i32) {
    %c0_i32 = arith.constant 0 : i32
    %c0_i32_0 = arith.constant 0 : i32
    %c0_i32_1 = arith.constant 0 : i32
    return %c0_i32, %c0_i32_0 : i32, i32
  }
  func.func @transform_3(%arg0: i32, %arg1: i32) -> (i32, i32) {
    %c0_i32 = arith.constant 0 : i32
    %c0_i32_0 = arith.constant 0 : i32
    %c0_i32_1 = arith.constant 0 : i32
    return %c0_i32, %c0_i32_0 : i32, i32
  }
  func.func @transform_4(%arg0: i32, %arg1: i32) -> (i32, i32) {
    %c0_i32 = arith.constant 0 : i32
    %c0_i32_0 = arith.constant 0 : i32
    %c0_i32_1 = arith.constant 0 : i32
    return %c0_i32, %c0_i32_0 : i32, i32
  }
  func.func @transform_5(%arg0: i32, %arg1: i32) -> (i32, i32, i32) {
    %c0_i32 = arith.constant 0 : i32
    %c0_i32_0 = arith.constant 0 : i32
    return %arg0, %arg1, %c0_i32 : i32, i32, i32
  }
}

</mosaic_0001>

<bundles_post_ra>
// kernel: fast_ff_layer.2
= control target key start
LH: loop header
LB: loop body
LE: loop exit
PB: predicated region body
PF: predicated region fallthrough
CT: control target
= control target key end

     0   :  { %10 = vsyncpa [#allocation3], 0  ;;  %s764_s0 = inlined_call_operand.hbm [shape: f32[16,32], index: 0, kind: input, shape index: {}]   ;;  %s765_s1 = inlined_call_operand.hbm [shape: f32[1,32], index: 1, kind: input, shape index: {}]   ;;  %s766_s2 = inlined_call_operand.hbm [shape: f32[1,32], index: 2, kind: input, shape index: {}]   ;;  %s767_s3 = inlined_call_operand.hbm [shape: bf16[32,128], index: 3, kind: input, shape index: {}]   ;;  %s768_s4 = inlined_call_operand.hbm [shape: bf16[32,32], index: 4, kind: input, shape index: {}]   ;;  %s769_s5 = inlined_call_operand.hbm [shape: bf16[16,128], index: 5, kind: output, shape index: {}]  }
   0x1   :  { %11 = vsyncpa [#allocation6], 0 }
   0x2   :  { %12 = vsyncpa [#allocation9], 0 }
   0x3   :  { %13 = vsyncpa [#allocation4], 0  ;;  %s613_s18 = smov [#allocation5]   ;;  %s614_s20 = smov [#allocation8]  }
   0x4   :  { %s32_s19 = sshll.u32 %s613_s18, 4  ;;  %s51_s21 = sshll.u32 %s614_s20, 4  ;;  %s33_s19 = int_to_ptr.vmem [resolvable:$true] %s32_s19  ;;  %s657_s21 = int_to_ptr.vmem [resolvable:$true] %s51_s21 }
   0x5   :  { %s473_s24 = scalar_lea.hbm %s765_s1, 16 }
   0x6   :  { %p474_p0 = scmp.ne.s32.totalorder %s765_s1, %s473_s24  ;;  %p477_p1 = scmp.lt.u32.totalorder %s473_s24, %s765_s1 }
   0x8   :  { %p479_p2 = pnand %p477_p1, %p474_p0 }
   0xa   :  { %482 = shalt.err (!%p479_p2)
}
   0xb   :  { %s483_s29 = scalar_lea.vmem %s33_s19, 16  ;;  %s487_s30 = scalar_lea.vmem %s33_s19, 32 }
   0xc   :  { %p484_p3 = scmp.ne.s32.totalorder %s33_s19, %s483_s29  ;;  %p488_p4 = scmp.lt.s32.totalorder %s33_s19, %s33_s19 }
   0xd   :  { %p489_p5 = scmp.lt.s32.totalorder %s487_s30, %s483_s29 }
   0xf   :  { %p490_p6 = por %p489_p5, %p488_p4 }
  0x11   :  { %p491_p7 = pnand %p490_p6, %p484_p3 }
  0x13   :  { %494 = shalt.err (!%p491_p7)
}
  0x14   :  { %35 = dma.hbm_to_vmem [thread:$0]  %s765_s1, 16, %s33_s19, [#allocation6]  }
  0x15   :  { %s495_s10 = scalar_lea.hbm %s767_s3, 256 }
  0x16   :  { %p496_p8 = scmp.ne.s32.totalorder %s767_s3, %s495_s10  ;;  %p499_p9 = scmp.lt.u32.totalorder %s495_s10, %s767_s3 }
  0x18   :  { %p501_p10 = pnand %p499_p9, %p496_p8 }
  0x1a   :  { %504 = shalt.err (!%p501_p10)
}
  0x1b   :  { %s505_s15 = scalar_lea.vmem %s657_s21, 256  ;;  %p510_p12 = scmp.lt.s32.totalorder %s657_s21, %s657_s21 }
  0x1c   :  { %p506_p11 = scmp.ne.s32.totalorder %s657_s21, %s505_s15  ;;  %p511_p13 = scmp.lt.s32.totalorder %s505_s15, %s505_s15 }
  0x1e   :  { %p512_p0 = por %p511_p13, %p510_p12 }
  0x20   :  { %p513_p1 = pnand %p512_p0, %p506_p11 }
  0x22   :  { %516 = shalt.err (!%p513_p1)
}
  0x23   :  { %s615_s1 = smov 64   ;;  %s616_s16 = smov 4  }
  0x24   :  { %57 = dma.hbm_to_vmem [thread:$0]  %s767_s3, 256, %s657_s21, [#allocation9], %s615_s1, %s615_s1, %s616_s16  }
  0x25   :  { %s617_s19 = smov [#allocation2]   ;;  %s517_s24 = scalar_lea.hbm %s764_s0, 256 }
  0x26   :  { %s19_s20 = sshll.u32 %s617_s19, 4  ;;  %p518_p2 = scmp.ne.s32.totalorder %s764_s0, %s517_s24  ;;  %s20_s20 = int_to_ptr.vmem [resolvable:$true] %s19_s20 }
  0x27   :  { %p521_p3 = scmp.lt.u32.totalorder %s517_s24, %s764_s0 }
  0x29   :  { %p523_p4 = pnand %p521_p3, %p518_p2 }
  0x2b   :  { %526 = shalt.err (!%p523_p4)
}
  0x2c   :  { %s527_s29 = scalar_lea.vmem %s20_s20, 256  ;;  %p532_p6 = scmp.lt.s32.totalorder %s20_s20, %s20_s20 }
  0x2d   :  { %p528_p5 = scmp.ne.s32.totalorder %s20_s20, %s527_s29  ;;  %p533_p7 = scmp.lt.s32.totalorder %s527_s29, %s527_s29 }
  0x2f   :  { %p534_p8 = por %p533_p7, %p532_p6 }
  0x31   :  { %p535_p9 = pnand %p534_p8, %p528_p5 }
  0x33   :  { %538 = shalt.err (!%p535_p9)
}
  0x34   :  { %s618_s3 = smov 128   ;;  %s619_s21 = smov 8  }
  0x35   :  { %25 = dma.hbm_to_vmem [thread:$0]  %s764_s0, 256, %s20_s20, [#allocation3], %s618_s3, %s618_s3, %s619_s21  }
  0x36   :  { %s620_s7 = smov [#allocation7]   ;;  %s621_s9 = smov [#allocation10]  }
  0x37   :  { %s42_s8 = sshll.u32 %s620_s7, 4  ;;  %s63_s10 = sshll.u32 %s621_s9, 4  ;;  %s43_s8 = int_to_ptr.vmem [resolvable:$true] %s42_s8  ;;  %s64_s10 = int_to_ptr.vmem [resolvable:$true] %s63_s10 }
  0x38   :  { %s539_s13 = scalar_lea.hbm %s766_s2, 16 }
  0x39   :  { %p540_p10 = scmp.ne.s32.totalorder %s766_s2, %s539_s13  ;;  %p543_p11 = scmp.lt.u32.totalorder %s539_s13, %s766_s2 }
  0x3b   :  { %p545_p12 = pnand %p543_p11, %p540_p10 }
  0x3d   :  { %548 = shalt.err (!%p545_p12)
}
  0x3e   :  { %s549_s0 = scalar_lea.vmem %s43_s8, 16  ;;  %s553_s19 = scalar_lea.vmem %s43_s8, 32 }
  0x3f   :  { %p550_p13 = scmp.ne.s32.totalorder %s43_s8, %s549_s0  ;;  %p554_p0 = scmp.lt.s32.totalorder %s43_s8, %s43_s8 }
  0x40   :  { %p555_p1 = scmp.lt.s32.totalorder %s553_s19, %s549_s0 }
  0x42   :  { %p556_p2 = por %p555_p1, %p554_p0 }
  0x44   :  { %p557_p3 = pnand %p556_p2, %p550_p13 }
  0x46   :  { %560 = shalt.err (!%p557_p3)
}
  0x47   :  { %45 = dma.hbm_to_vmem [thread:$0]  %s766_s2, 16, %s43_s8, [#allocation6]  }
  0x48   :  { %s561_s25 = scalar_lea.hbm %s768_s4, 256 }
  0x49   :  { %p562_p4 = scmp.ne.s32.totalorder %s768_s4, %s561_s25  ;;  %p565_p5 = scmp.lt.u32.totalorder %s561_s25, %s768_s4 }
  0x4b   :  { %p567_p6 = pnand %p565_p5, %p562_p4 }
  0x4d   :  { %570 = shalt.err (!%p567_p6)
}
  0x4e   :  { %s571_s3 = scalar_lea.vmem %s64_s10, 256  ;;  %p576_p8 = scmp.lt.s32.totalorder %s64_s10, %s64_s10 }
  0x4f   :  { %p572_p7 = scmp.ne.s32.totalorder %s64_s10, %s571_s3  ;;  %p577_p9 = scmp.lt.s32.totalorder %s571_s3, %s571_s3 }
  0x51   :  { %p578_p10 = por %p577_p9, %p576_p8 }
  0x53   :  { %p579_p11 = pnand %p578_p10, %p572_p7 }
  0x55   :  { %582 = shalt.err (!%p579_p11)
}
  0x56   :  { %69 = dma.hbm_to_vmem [thread:$0]  %s768_s4, 256, %s64_s10, [#allocation9], %s615_s1, %s615_s1, %s616_s16  }
  0x57   :  { %605 = dma.done.wait [#allocation3], 256  }
  0x58   :  { %606 = vsyncadd [#allocation3], 4294967040 }
  0x59   :  { %607 = dma.done.wait [#allocation6], 32  }
  0x5a   :  { %608 = vsyncadd [#allocation6], 4294967264 }
  0x5b   :  { %609 = dma.done.wait [#allocation9], 512  }
  0x5c   :  { %610 = vsyncadd [#allocation9], 4294966784  ;;  %vm88_vm0 = vcmask 261120   ;;  %v86_v0 = vld [vmem:[#allocation2] sm:$0xff]  ;;  %v87_v1 = vld [vmem:[#allocation2 + $0x8] sm:$0xff]  ;;  %v622_v15 = vmov 0.0  }
  0x5d   :  { %v89_v2 = vsel %vm88_vm0, %v86_v0, 0.0  ;;  %v92_v3 = vsel %vm88_vm0, %v87_v1, 0.0  ;;  %v445_v14 = vld [vmem:[#allocation8] sm:$0xff]   ;;  %407 = vmatprep.subr.bf16.mxu0 %v622_v15  ;;  %415 = vmatprep.subr.bf16.mxu1 %v622_v15  ;;  %v446_v16 = vld [vmem:[#allocation8 + $0x8] sm:$0xff]   ;;  %vm623_vm1 = vmmov 0   ;;  %v447_v34 = vld [vmem:[#allocation10] sm:$0xff]  }
  0x5e   :  { %90 = vadd.xlane.f32.xlu0 %v89_v2  ;;  %408 = vmatpush3.bf16.msra.mxu0 %v445_v14  ;;  %v378_v25 = vld [vmem:[#allocation5] ss:$0 sm:$0xff]  ;;  %v379_v29 = vld [vmem:[#allocation7] ss:$0 sm:$0xff]  ;;  %s624_s4 = smov 96   ;;  %s625_s30 = smov 32  }
  0x5f   :  { %411 = vmatprep.mubr.msk.bf16.mxu0 %vm623_vm1, %v622_v15  ;;  %409 = vmatprep.subr.bf16.mxu0 %v622_v15  ;;  %v448_v35 = vld [vmem:[#allocation10 + $0x8] sm:$0xff]   ;;  %vm343_vm4 = vcmask 523264   ;;  %vm346_vm5 = vcmask 785408   ;;  %s626_s6 = smov [#allocation11]  }
  0x60   :  { %419 = vmatprep.mubr.msk.bf16.mxu1 %vm623_vm1, %v622_v15  ;;  %416 = vmatpush3.bf16.msra.mxu1 %v447_v34  ;;  %s364_s7 = sshll.u32 %s626_s6, 4  ;;  %s365_s7 = int_to_ptr.vmem [resolvable:$true] %s364_s7 }
  0x61   :  { %417 = vmatprep.subr.bf16.mxu1 %v622_v15  ;;  %s583_s8 = scalar_lea.vmem %s365_s7, 128  ;;  %p588_p13 = scmp.lt.s32.totalorder %s365_s7, %s365_s7 }
  0x62   :  { %93 = vadd.xlane.f32.xlu0 %v92_v3  ;;  %410 = vmatpush3.bf16.msra.mxu0 %v446_v16  ;;  %p584_p12 = scmp.ne.s32.totalorder %s365_s7, %s583_s8  ;;  %p589_p0 = scmp.lt.s32.totalorder %s583_s8, %s583_s8 }
  0x63   :  { %423 = vmatprep.subr.bf16.mxu0 %v622_v15 }
  0x64   :  { %418 = vmatpush3.bf16.msra.mxu1 %v448_v35  ;;  %p590_p1 = por %p589_p0, %p588_p13 }
  0x66   :  { %p591_p2 = pnand %p590_p1, %p584_p12 }
  0xeb   :  { %v91_v4 = vpop.xlane.xlu0 %90 }
  0xec   :  { %v96_v5 = vmul.f32 0.03125, %v91_v4 }
  0xee   :  { %v98_v6 = vsub.f32 %v86_v0, %v96_v5 }
  0xef   :  { %v94_v7 = vpop.xlane.xlu0 %93 }
  0xf0   :  { %v97_v8 = vmul.f32 0.03125, %v94_v7  ;;  %v100_v9 = vmul.f32 %v98_v6, %v98_v6 }
  0xf2   :  { %v99_v10 = vsub.f32 %v87_v1, %v97_v8  ;;  %v102_v11 = vsel %vm88_vm0, %v100_v9, 0.0 }
  0xf3   :  { %103 = vadd.xlane.f32.xlu1 %v102_v11 }
  0xf4   :  { %v101_v12 = vmul.f32 %v99_v10, %v99_v10 }
  0xf6   :  { %v105_v13 = vsel %vm88_vm0, %v101_v12, 0.0 }
  0xf7   :  { %106 = vadd.xlane.f32.xlu1 %v105_v13 }
 0x180   :  { %v104_v17 = vpop.xlane.xlu1 %103 }
 0x181   :  { %v108_v18 = vmul.f32 0.03125, %v104_v17 }
 0x183   :  { %v110_v19 = vadd.f32 1e-05, %v108_v18 }
 0x184   :  { %v107_v20 = vpop.xlane.xlu1 %106 }
 0x185   :  { %449 = vrsqrt.f32 %v110_v19  ;;  %v109_v21 = vmul.f32 0.03125, %v107_v20 }
 0x187   :  { %v111_v22 = vadd.f32 1e-05, %v109_v21 }
 0x189   :  { %451 = vrsqrt.f32 %v111_v22 }
 0x18f   :  { %v450_v23 = vpop.eup %449 }
 0x190   :  { %v114_v24 = vmul.f32 %v450_v23, %v98_v6 }
 0x192   :  { %v123_v28 = vmul.f32 %v378_v25, %v114_v24 }
 0x193   :  { %v452_v26 = vpop.eup %451 }
 0x194   :  { %v115_v27 = vmul.f32 %v452_v26, %v99_v10  ;;  %v132_v31 = vadd.f32 %v379_v29, %v123_v28 }
 0x196   :  { %v124_v30 = vmul.f32 %v378_v25, %v115_v27 }
 0x198   :  { %v133_v32 = vadd.f32 %v379_v29, %v124_v30 }
 0x19a   :  { %v134_v33 = vpack.c.bf16 %v133_v32, %v132_v31 }
 0x19c   :  { %412 = vmatmul.mubr.msk.bf16.vlgmr.msra.gmra.mrb[0].mxu0 %vm88_vm0, %v134_v33 }
 0x19d   :  { %427 = vmatprep.mubr.msk.bf16.mxu0 %vm623_vm1, %v622_v15  ;;  %424 = vmatpush3.bf16.msra.mxu0 %v447_v34 }
 0x19e   :  { %425 = vmatprep.subr.bf16.mxu0 %v622_v15 }
 0x1a1   :  { %426 = vmatpush3.bf16.msra.mxu0 %v448_v35 }
 0x26f   :  { %v188_v36 = vpop.f32.mrb[0].mxu0 }
 0x270   :  { %v199_v37 = vmul.f32 1.442695, %v188_v36  ;;  %v413_v38 = vpop.f32.mrb[1].mxu0  ;;  %v197_v43 = vadd.f32 1.0, %v188_v36  ;;  %vm195_vm2 = vcmp.gt.f32.partialorder %v188_v36, 0.0 }
 0x271   :  { %v738_v39 = vpop.f32.mrb[2].mxu0  ;;  %v387_v58 = vmul.f32 -1.442695, %v188_v36 }
 0x272   :  { %453 = vpow2.f32 %v199_v37  ;;  %v201_v40 = vmul.f32 1.442695, %v738_v39  ;;  %v414_v41 = vpop.f32.mrb[3].mxu0  ;;  %v198_v44 = vadd.f32 1.0, %v738_v39  ;;  %vm196_vm3 = vcmp.gt.f32.partialorder %v738_v39, 0.0 }
 0x273   :  { %v388_v59 = vmul.f32 -1.442695, %v738_v39 }
 0x274   :  { %455 = vpow2.f32 %v201_v40 }
 0x275   :  { %457 = vpow2.f32 %v387_v58 }
 0x276   :  { %459 = vpow2.f32 %v388_v59 }
 0x27c   :  { %v454_v42 = vpop.eup %453 }
 0x27d   :  { %v203_v46 = vsel %vm195_vm2, %v197_v43, %v454_v42 }
 0x27e   :  { %v456_v45 = vpop.eup %455 }
 0x27f   :  { %v204_v47 = vsel %vm196_vm3, %v198_v44, %v456_v45  ;;  %v458_v60 = vpop.eup %457 }
 0x280   :  { %v209_v48 = vpack.c.bf16 %v204_v47, %v203_v46  ;;  %v335_v61 = vadd.f32 1.0, %v458_v60  ;;  %v460_v63 = vpop.eup %459 }
 0x281   :  { %v336_v1 = vadd.f32 1.0, %v460_v63 }
 0x282   :  { %271 = vrot.lane.b32.xlu0 %v209_v48, %s624_s4  ;;  %420 = vmatmul.mubr.msk.bf16.vlgmr.msra.gmra.mrb[0].mxu1 %vm88_vm0, %v209_v48 }
 0x2f4   :  { %v272_v49 = vpop.permute.xlu0 %271 }
 0x2f5   :  { %428 = vmatmul.mubr.msk.bf16.vlgmr.msra.gmra.mrb[4].mxu0 %vm88_vm0, %v272_v49 }
 0x355   :  { %v259_v50 = vpop.f32.mrb[0].mxu1 }
 0x356   :  { %v421_v51 = vpop.f32.mrb[1].mxu1  ;;  %461 = vrcp.f32 %v259_v50 }
 0x357   :  { %v262_v52 = vpop.f32.mrb[2].mxu1 }
 0x358   :  { %v422_v53 = vpop.f32.mrb[3].mxu1 }
 0x360   :  { %v462_v2 = vpop.eup %461 }
 0x361   :  { %v267_v4 = vmul.f32 %v462_v2, %v203_v46 }
 0x3c8   :  { %v310_v54 = vpop.f32.mrb[4].mxu0 }
 0x3c9   :  { %319 = vrot.lane.b32.xlu1 %v310_v54, %s625_s30  ;;  %v429_v55 = vpop.f32.mrb[5].mxu0 }
 0x3ca   :  { %v313_v56 = vpop.f32.mrb[6].mxu0 }
 0x3cb   :  { %v430_v57 = vpop.f32.mrb[7].mxu0 }
 0x3cd   :  { %321 = vrot.lane.b32.xlu1 %v313_v56, %s625_s30 }
 0x43b   :  { %v320_v62 = vpop.permute.xlu1 %319 }
 0x43c   :  { %463 = vrcp.f32 %v320_v62 }
 0x43d   :  { %465 = vrcp.f32 %v262_v52 }
 0x43e   :  { %467 = vrcp.f32 %v335_v61 }
 0x43f   :  { %v322_v0 = vpop.permute.xlu1 %321 }
 0x440   :  { %469 = vrcp.f32 %v322_v0 }
 0x441   :  { %471 = vrcp.f32 %v336_v1 }
 0x446   :  { %v464_v3 = vpop.eup %463 }
 0x447   :  { %v326_v5 = vmul.f32 %v464_v3, %v203_v46  ;;  %v466_v6 = vpop.eup %465 }
 0x448   :  { %v468_v7 = vpop.eup %467  ;;  %v269_v11 = vmul.f32 %v466_v6, %v204_v47 }
 0x449   :  { %v341_v8 = vsel %vm88_vm0, %v267_v4, %v326_v5 }
 0x44a   :  { %v470_v9 = vpop.eup %469  ;;  %v344_v10 = vsel %vm343_vm4, %v341_v8, %v188_v36 }
 0x44b   :  { %v328_v12 = vmul.f32 %v470_v9, %v204_v47  ;;  %v347_v13 = vsel %vm346_vm5, %v344_v10, %v468_v7  ;;  %v472_v15 = vpop.eup %471 }
 0x44d   :  { %v342_v14 = vsel %vm88_vm0, %v269_v11, %v328_v12 }
 0x44e   :  { %v345_v16 = vsel %vm343_vm4, %v342_v14, %v738_v39 }
 0x44f   :  { %v348_v17 = vsel %vm346_vm5, %v345_v16, %v472_v15 }
 0x450   :  { %v396_v18 = vpack.c.bf16 %v348_v17, %v347_v13 }
 0x452   :  { %397 = vst [vmem:[#allocation11] sm:$0xff] %v396_v18  }
 0x453   :  { %594 = shalt.err (!%p591_p2)
}
 0x454   :  { %s595_s11 = scalar_lea.hbm %s769_s5, 128 }
 0x455   :  { %p596_p3 = scmp.ne.s32.totalorder %s769_s5, %s595_s11  ;;  %p599_p4 = scmp.lt.u32.totalorder %s595_s11, %s769_s5 }
 0x457   :  { %p601_p5 = pnand %p599_p4, %p596_p3 }
 0x459   :  { %604 = shalt.err (!%p601_p5)
}
 0x45a   :  { %370 = dma.vmem_to_hbm [thread:$0]  %s365_s7, 128, %s769_s5, [#allocation4], %s615_s1, %s615_s1, %s616_s16  }
 0x45b   :  { %611 = dma.done.wait [#allocation4], 128  }
 0x45c   :  { %612 = vsyncadd [#allocation4], 4294967168 }
 0x45d   :  { %374 = vsyncpa [#allocation3], 1 }
 0x45e   :  { %375 = vsyncpa [#allocation6], 1 }
 0x45f   :  { %376 = vsyncpa [#allocation9], 1 }
 0x460   :  { %377 = vsyncpa [#allocation4], 1 }

// kernel: fast_ff_layer.3
= control target key start
LH: loop header
LB: loop body
LE: loop exit
PB: predicated region body
PF: predicated region fallthrough
CT: control target
= control target key end

     0   :  { %s4415_s0 = inlined_call_operand.hbm [shape: bf16[2,8,128], index: 0, kind: input, shape index: {}]   ;;  %s4416_s1 = inlined_call_operand.hbm [shape: f32[2,8,32], index: 1, kind: input, shape index: {}, may-alias: {1,5}]   ;;  %s4417_s2 = inlined_call_operand.hbm [shape: f32[8,8], index: 2, kind: input, shape index: {}]   ;;  %s4418_s3 = inlined_call_operand.hbm [shape: f32[8,8], index: 3, kind: input, shape index: {}]   ;;  %s4419_s4 = inlined_call_operand.hbm [shape: bf16[32,32], index: 4, kind: input, shape index: {}]   ;;  %s4420_s5 = inlined_call_operand.hbm [shape: f32[2,8,32], index: 5, kind: output, shape index: {}, may-alias: {1,5}]  }
   0x1   :  { %4425 = sst [smem:[#allocation20_spill]] %s4415_s0 }
   0x2   :  { %4426 = sst [smem:[#allocation21_spill]] %s4417_s2 }
   0x3   :  { %4427 = sst [smem:[#allocation22_spill]] %s4418_s3 }
   0x4   :  { %10 = vsyncpa [#allocation6], 0 }
   0x5   :  { %12 = vsyncpa [#allocation6 + $0x1], 0 }
   0x6   :  { %13 = vsyncpa [#allocation9], 0 }
   0x7   :  { %15 = vsyncpa [#allocation9 + $0x1], 0 }
   0x8   :  { %16 = vsyncpa [#allocation12], 0 }
   0x9   :  { %17 = vsyncpa [#allocation7], 0 }
   0xa   :  { %19 = vsyncpa [#allocation7 + $0x1], 0  ;;  %s3703_s18 = smov 0   ;;  %s3705_s19 = smov 0  }
   0xb   :  { %s3707_s20 = smov 0   ;;  %s3709_s21 = smov 0  }
   0xc   :  { %s3711_s22 = smov 0   ;;  %s3713_s23 = smov 0  }
   0xd LB: > { %s3734_s24 = sadd.s32 4294967295, %s3645_s23   ;;  %s2833_s25 = sadd.s32 4294967294, %s3645_s23   ;;  %s3645_s23 = sphi %s3713_s23, %s25_s23   ;;  %s3641_s22 = sphi %s3711_s22, %s4453_s22   ;;  %s3637_s21 = sphi %s3709_s21, %s4452_s21   ;;  %s3633_s20 = sphi %s3707_s20, %s4451_s20   ;;  %s3629_s19 = sphi %s3705_s19, %s4450_s19   ;;  %s3625_s18 = sphi %s3703_s18, %s4449_s18  }
   0xe   : > { %p59_p0 = scmp.ne.s32.totalorder %s3629_s19, %s3625_s18  ;;  %p4421_p1 = scmp.eq.s32.totalorder %s3734_s24, 0 }
   0xf   : > { %p182_p3 = scmp.eq.s32.totalorder %s2833_s25, 1  ;;  %p2834_p5 = scmp.ge.s32.totalorder %s3645_s23, 1 }
  0x10   : > { %p3743_p4 = por %p4421_p1, %p59_p0  ;;  %p189_p7 = scmp.lt.s32.totalorder %s3645_s23, 3 }
  0x11   : > { %p3748_p6 = por %p182_p3, %p59_p0  ;;  %s3647_s29 = smov [#allocation10]  }
  0x12   : > { %s4428_s26 = scalar_select %p3743_p4, 1, 0 }
  0x13   : > { %s4429_s27 = scalar_select %p3748_p6, 1, 0 }
  0x14   : > { %p3753_p8 = pnand %p2834_p5, %p189_p7  ;;  %s202_s30 = sshll.u32 %s3647_s29, 4  ;;  %s203_s30 = int_to_ptr.vmem [resolvable:$true] %s202_s30 }
  0x15   : > { %s3648_s6 = smov [#allocation11]   ;;  %s3649_s9 = smov [#allocation13]  }
  0x16   : > { %s4430_s28 = scalar_select %p3753_p8, 1, 0 }
  0x17   : > { %p3299_p10 = pneg %p3753_p8  ;;  %s213_s7 = sshll.u32 %s3648_s6, 4  ;;  %s3766_s7 = int_to_ptr.vmem [resolvable:$true] %s213_s7 }
  0x18   : > { %s223_s10 = sshll.u32 %s3649_s9, 4  ;;  %s4432_s2 = sld [smem:[#allocation21_spill]]  ;;  %s3768_s10 = int_to_ptr.vmem [resolvable:$true] %s223_s10 }
  0x19   : > { %p3762_p11 = pnand %p3299_p10, %p4421_p1 }
  0x1b   : > { %p3778_p13 = pneg %p3762_p11 }
  0x1e   : > { %s3407_s13 = scalar_lea.hbm %s4432_s2, 128 }
  0x1f   : > { %p3408_p12 = scmp.ne.s32.totalorder %s4432_s2, %s3407_s13  ;;  %p3414_p5 = scmp.lt.u32.totalorder %s3407_s13, %s4432_s2 }
  0x21   : > { %p3410_p0 = pnand %p3778_p13, %p3408_p12 }
  0x23   : > { %p3411_p3 = pneg %p3410_p0 }
  0x25   : > { %p3416_p7 = pnand %p3414_p5, %p3411_p3 }
  0x27   : > { %3419 = shalt.err (!%p3416_p7)
}
  0x28   : > { %s3420_s29 = scalar_lea.vmem %s203_s30, 128  ;;  %p3428_p2 = scmp.lt.s32.totalorder %s203_s30, %s203_s30 }
  0x29   : > { %p3421_p10 = scmp.ne.s32.totalorder %s203_s30, %s3420_s29  ;;  %p3429_p6 = scmp.lt.s32.totalorder %s3420_s29, %s3420_s29 }
  0x2b   : > { %p3423_p9 = pnand %p3421_p10, %p3778_p13  ;;  %p3430_p4 = por %p3429_p6, %p3428_p2 }
  0x2d   : > { %p3424_p1 = pneg %p3423_p9 }
  0x2f   : > { %p3431_p8 = pnand %p3430_p4, %p3424_p1 }
  0x31   : > { %3434 = shalt.err (!%p3431_p8)
}
  0x32   : > { %3302 = dma.hbm_to_vmem [thread:$0]  (!%p3762_p11), %s4432_s2, 128, %s203_s30, [#allocation9]  }
  0x33   : > { %s4434_s3 = sld [smem:[#allocation22_spill]] }
  0x39   : > { %s3435_s13 = scalar_lea.hbm %s4434_s3, 128 }
  0x3a   : > { %p3436_p9 = scmp.ne.s32.totalorder %s4434_s3, %s3435_s13  ;;  %p3442_p1 = scmp.lt.u32.totalorder %s3435_s13, %s4434_s3 }
  0x3c   : > { %p3438_p12 = pnand %p3436_p9, %p3778_p13 }
  0x3e   : > { %p3439_p2 = pneg %p3438_p12 }
  0x40   : > { %p3444_p4 = pnand %p3442_p1, %p3439_p2 }
  0x42   : > { %3447 = shalt.err (!%p3444_p4)
}
  0x43   : > { %s3448_s30 = scalar_lea.vmem %s3766_s7, 128  ;;  %p3456_p3 = scmp.lt.s32.totalorder %s3766_s7, %s3766_s7 }
  0x44   : > { %p3449_p6 = scmp.ne.s32.totalorder %s3766_s7, %s3448_s30  ;;  %p3457_p5 = scmp.lt.s32.totalorder %s3448_s30, %s3448_s30 }
  0x46   : > { %p3451_p8 = pnand %p3449_p6, %p3778_p13  ;;  %p3458_p7 = por %p3457_p5, %p3456_p3 }
  0x48   : > { %p3452_p0 = pneg %p3451_p8 }
  0x4a   : > { %p3459_p10 = pnand %p3458_p7, %p3452_p0 }
  0x4c   : > { %3462 = shalt.err (!%p3459_p10)
}
  0x4d   : > { %3305 = dma.hbm_to_vmem [thread:$0]  (!%p3762_p11), %s4434_s3, 128, %s3766_s7, [#allocation12]  }
  0x4e   : > { %s3463_s12 = scalar_lea.hbm %s4419_s4, 256 }
  0x4f   : > { %p3464_p9 = scmp.ne.s32.totalorder %s4419_s4, %s3463_s12  ;;  %p3470_p1 = scmp.lt.u32.totalorder %s3463_s12, %s4419_s4 }
  0x51   : > { %p3466_p12 = pnand %p3464_p9, %p3778_p13 }
  0x53   : > { %p3467_p2 = pneg %p3466_p12 }
  0x55   : > { %p3472_p4 = pnand %p3470_p1, %p3467_p2 }
  0x57   : > { %3475 = shalt.err (!%p3472_p4)
}
  0x58   : > { %s3476_s7 = scalar_lea.vmem %s3768_s10, 256  ;;  %p3484_p3 = scmp.lt.s32.totalorder %s3768_s10, %s3768_s10 }
  0x59   : > { %p3477_p6 = scmp.ne.s32.totalorder %s3768_s10, %s3476_s7  ;;  %p3485_p5 = scmp.lt.s32.totalorder %s3476_s7, %s3476_s7 }
  0x5b   : > { %p3479_p8 = pnand %p3477_p6, %p3778_p13  ;;  %p3486_p7 = por %p3485_p5, %p3484_p3 }
  0x5d   : > { %p3480_p0 = pneg %p3479_p8 }
  0x5f   : > { %p3487_p10 = pnand %p3486_p7, %p3480_p0 }
  0x61   : > { %3490 = shalt.err (!%p3487_p10)
}
  0x62   : > { %s3650_s25 = smov 64   ;;  %s3651_s16 = smov 4  }
  0x63   : > { %3308 = dma.hbm_to_vmem [thread:$0]  (!%p3762_p11), %s4419_s4, 256, %s3768_s10, [#allocation12], %s3650_s25, %s3650_s25, %s3651_s16  }
  0x64   : > { %s46_s6 = sadd.s32 1, %s3633_s20  ;;  %s37_s9 = sadd.s32 1, %s3641_s22 }
  0x65   : > { %p53_p13 = scmp.ne.s32.totalorder %s3633_s20, %s3629_s19  ;;  %p39_p9 = scmp.ge.s32.totalorder %s37_s9, 2 }
  0x66   : > { %p54_p12 = scmp.eq.s32.totalorder %s3645_s23, 0  ;;  %p4435_p2 = scmp.eq.s32.totalorder %s3734_s24, 1 }
  0x67   : > { %p3323_p4 = scmp.lt.s32.totalorder %s3645_s23, 2  ;;  %s4455_s9 = smov (%p39_p9, %s37_s9), 0 }
  0x68   : > { %p3847_p1 = por %p4435_p2, %p53_p13  ;;  %p55_p6 = por %p54_p12, %p53_p13 }
  0x69   : > { %s3855_s8 = sand.u32 1, %s3633_s20   ;;  %s41_s10 = ssub.s32 %s3641_s22, %s4455_s9 }
  0x6a   : > { %s4436_s11 = scalar_select %p3847_p1, 1, 0 }
  0x6b   : > { %p44_p11 = scmp.eq.s32.totalorder %s41_s10, 0  ;;  %s2839_s12 = sshll.u32 %s3855_s8, 2 }
  0x6c   : > { %s2840_s13 = sshll.u32 %s3641_s22, 6  ;;  %s4437_s0 = sld [smem:[#allocation20_spill]] }
  0x6d   : > { %s3862_s14 = scalar_select %p44_p11, %s3633_s20, %s46_s6  }
  0x6e   : > { %s241_s25 = scalar_lea.vmem [#allocation5], %s2839_s12  ;;  %p3873_p8 = pnand %p3323_p4, %p55_p6 }
  0x6f   : > { %s249_s16 = sshll.u32 %s241_s25, 4  ;;  %s2841_s6 = sshll.u32 %s3855_s8, 3  ;;  %s3869_s16 = int_to_ptr.vmem [resolvable:$true] %s249_s16 }
  0x70   : > { %s238_s10 = scalar_lea.sflag [#allocation6], %s3855_s8  ;;  %p3493_p3 = pneg %p3873_p8 }
  0x72   : > { %s3867_s7 = scalar_lea.hbm %s4437_s0, %s2840_s13  ;;  %s3496_s17 = scalar_lea.hbm %s4437_s0, 128 }
  0x73   : > { %s3491_s13 = scalar_lea.hbm %s3867_s7, 64  ;;  %p3497_p10 = scmp.lt.u32.totalorder %s3867_s7, %s4437_s0 }
  0x74   : > { %p3492_p0 = scmp.ne.s32.totalorder %s3867_s7, %s3491_s13  ;;  %p3498_p13 = scmp.lt.u32.totalorder %s3496_s17, %s3491_s13 }
  0x75   : > { %p3500_p12 = scmp.lt.u32.totalorder %s3491_s13, %s3867_s7 }
  0x76   : > { %p3494_p5 = pnand %p3493_p3, %p3492_p0  ;;  %p3499_p9 = por %p3498_p13, %p3497_p10 }
  0x78   : > { %p3495_p7 = pneg %p3494_p5  ;;  %p3501_p2 = por %p3500_p12, %p3499_p9 }
  0x7a   : > { %p3502_p4 = pnand %p3501_p2, %p3495_p7 }
  0x7c   : > { %3505 = shalt.err (!%p3502_p4)
}
  0x7d   : > { %s3506_s29 = scalar_lea.vmem %s3869_s16, 64  ;;  %s3652_s12 = smov [#allocation5]  }
  0x7e   : > { %p3507_p6 = scmp.ne.s32.totalorder %s3869_s16, %s3506_s29  ;;  %s3511_s15 = sshll.u32 %s3652_s12, 4  ;;  %s3512_s15 = int_to_ptr.vmem [resolvable:$false] %s3511_s15 }
  0x7f   : > { %s3513_s2 = scalar_lea.vmem %s3512_s15, 128  ;;  %p3514_p5 = scmp.lt.s32.totalorder %s3869_s16, %s3512_s15 }
  0x80   : > { %p3509_p11 = pnand %p3507_p6, %p3493_p3  ;;  %p3515_p10 = scmp.lt.s32.totalorder %s3513_s2, %s3506_s29 }
  0x82   : > { %p3510_p0 = pneg %p3509_p11  ;;  %p3516_p13 = por %p3515_p10, %p3514_p5 }
  0x84   : > { %p3517_p9 = pnand %p3516_p13, %p3510_p0 }
  0x86   : > { %3520 = shalt.err (!%p3517_p9)
}
  0x87   : > { %3312 = dma.hbm_to_vmem [thread:$0]  (!%p3873_p8), %s3867_s7, 64, %s3869_s16, %s238_s10  }
  0x88   : > { %s2842_s13 = sshll.u32 %s3641_s22, 7  ;;  %s260_s29 = scalar_lea.vmem [#allocation8], %s2841_s6 }
  0x89   : > { %s3909_s12 = scalar_lea.hbm %s4416_s1, %s2842_s13  ;;  %s268_s15 = sshll.u32 %s260_s29, 4  ;;  %s269_s15 = int_to_ptr.vmem [resolvable:$true] %s268_s15 }
  0x8a   : > { %s4439_s2 = sand.u32 1, %s3645_s23   ;;  %s3521_s3 = scalar_lea.hbm %s3909_s12, 128 }
  0x8b   : > { %s257_s0 = scalar_lea.sflag [#allocation9], %s4439_s2  ;;  %p3522_p7 = scmp.ne.s32.totalorder %s3909_s12, %s3521_s3 }
  0x8c   : > { %s3526_s10 = scalar_lea.hbm %s4416_s1, 256  ;;  %p3527_p4 = scmp.lt.u32.totalorder %s3909_s12, %s4416_s1 }
  0x8d   : > { %p3524_p12 = pnand %p3522_p7, %p3493_p3  ;;  %p3528_p6 = scmp.lt.u32.totalorder %s3526_s10, %s3521_s3 }
  0x8e   : > { %p3530_p0 = scmp.lt.u32.totalorder %s3521_s3, %s3909_s12 }
  0x8f   : > { %p3525_p2 = pneg %p3524_p12  ;;  %p3529_p11 = por %p3528_p6, %p3527_p4 }
  0x91   : > { %p3531_p5 = por %p3530_p0, %p3529_p11 }
  0x93   : > { %p3532_p10 = pnand %p3531_p5, %p3525_p2 }
  0x95   : > { %3535 = shalt.err (!%p3532_p10)
}
  0x96   : > { %s3536_s6 = scalar_lea.vmem %s269_s15, 128  ;;  %s3653_s17 = smov [#allocation8]  }
  0x97   : > { %p3537_p13 = scmp.ne.s32.totalorder %s269_s15, %s3536_s6  ;;  %s3541_s25 = sshll.u32 %s3653_s17, 4  ;;  %s3542_s25 = int_to_ptr.vmem [resolvable:$false] %s3541_s25 }
  0x98   : > { %s3543_s29 = scalar_lea.vmem %s3542_s25, 256  ;;  %p3544_p12 = scmp.lt.s32.totalorder %s269_s15, %s3542_s25 }
  0x99   : > { %p3539_p9 = pnand %p3537_p13, %p3493_p3  ;;  %p3545_p1 = scmp.lt.s32.totalorder %s3543_s29, %s3536_s6 }
  0x9b   : > { %p3540_p7 = pneg %p3539_p9  ;;  %p3546_p4 = por %p3545_p1, %p3544_p12 }
  0x9d   : > { %p3547_p6 = pnand %p3546_p4, %p3540_p7 }
  0x9f   : > { %3550 = shalt.err (!%p3547_p6)
}
  0xa0   : > { %3315 = dma.hbm_to_vmem [thread:$0]  (!%p3873_p8), %s3909_s12, 128, %s269_s15, %s257_s0  }
  0xa1   : > { %p4440_p2 = scmp.ne.s32.totalorder %s4430_s28, 0 }
  0xa2   : > { %s3937_s3 = sand.u32 (!%p4440_p2), 1, %s3629_s19   ;;  %p4441_p3 = scmp.ne.s32.totalorder (!%p4440_p2), %s4428_s26, 0 }
  0xa3   : > { %277 = sbr.rel (%p4440_p2) target bundleno = 8621 (0x21ad), region = 40  ;;  %s2844_s2 = sshll.u32 (!%p4440_p2), %s3937_s3, 2 }
  0xa4   : > { %s280_s7 = scalar_lea.sflag (!%p4440_p2), [#allocation6], %s3937_s3  ;;  %s283_s16 = scalar_lea.vmem (!%p4440_p2), [#allocation5], %s2844_s2 }
  0xaa   : > { %3604 = dma.done.wait (%p4441_p3), %s280_s7, 64  }
  0xab   : > { %3606 = vsyncadd (%p4441_p3), %s280_s7, 4294967232  ;;  %s288_s0 = sand.u32 1, %s3734_s24   ;;  %s2845_s28 = sshll.u32 %s3937_s3, 3 }
  0xac   : > { %s289_s30 = scalar_lea.sflag [#allocation9], %s288_s0  ;;  %s3949_s12 = scalar_lea.vmem [#allocation8], %s2845_s28 }
  0xad   : > { %3608 = dma.done.wait (%p4441_p3), %s289_s30, 128  }
  0xae   : > { %3610 = vsyncadd (%p4441_p3), %s289_s30, 4294967168  ;;  %p4442_p1 = scmp.eq.s32.totalorder %s3734_s24, 0 }
  0xb0   : > { %3612 = dma.done.wait (%p4442_p1), [#allocation9], 128   ;;  %p4443_p8 = pmov %p4442_p1 }
  0xb1   : > { %p4444_p11 = pmov %p4442_p1 }
  0xb2   : > { %3614 = vsyncadd (%p4443_p8), [#allocation9], 4294967168 }
  0xb3   : > { %3616 = dma.done.wait (%p4444_p11), [#allocation12], 384   ;;  %p4445_p0 = pmov %p4442_p1 }
  0xb4   : > { %vm341_vm0 = vcmask 64512   ;;  %v3654_v0 = vmov 0.0   ;;  %vm3655_vm1 = vmmov 0   ;;  %v3977_v1 = vld [vmem:[%s283_s16] sm:$0xf]  ;;  %vm361_vm2 = vcmask 1043456  }
  0xb5   : > { %3618 = vsyncadd (%p4445_p0), [#allocation12], 4294966912  ;;  %2993 = vmatprep.subr.bf16.mxu0 %v3654_v0  ;;  %342 = vst.msk [vmem:[#allocation2] sm:$0xff] %vm341_vm0, %v3654_v0  ;;  %2999 = vmatprep.subr.bf16.mxu1 %v3654_v0  ;;  %v3981_v2 = vcombine.low %v3977_v1, %v3977_v1  ;;  %s3656_s24 = smov 96   ;;  %v3657_v8 = vmov 96   ;;  %s3658_s26 = smov 64   ;;  %v4008_v17 = vunpack.c.l.bf16 %v3977_v1 }
  0xb6   : > { %343 = vst.msk [vmem:[#allocation2 + $0x8] sm:$0xff] %vm341_vm0, %v3654_v0  ;;  %344 = vst.msk [vmem:[#allocation2 + $0x10] sm:$0xff] %vm341_vm0, %v3654_v0  ;;  %2995 = vmatprep.mubr.msk.bf16.mxu0 %vm3655_vm1, %v3654_v0  ;;  %3001 = vmatprep.mubr.msk.bf16.mxu1 %vm3655_vm1, %v3654_v0  ;;  %s3659_s15 = smov 32   ;;  %v4015_v25 = vld [vmem:[#allocation10] sm:$0xff]  ;;  %s3660_s10 = smov 88   ;;  %vm1420_vm3 = vcmask 130112  }
  0xb7   : > { %345 = vst.msk [vmem:[#allocation2 + $0x18] sm:$0xff] %vm341_vm0, %v3654_v0  ;;  %355 = vrot.lane.b32.xlu0 %v3981_v2, %s3656_s24  ;;  %3400 = vset.pattern.permute.xlu1 %v3657_v8  ;;  %s3662_s8 = smov 72   ;;  %s3663_s13 = smov 24   ;;  %vm1988_vm4 = vcmask 195712   ;;  %vm2556_vm5 = vcmask 261312   ;;  %vm2639_vm6 = vcmask 261120  }
  0xb8   : > { %s3664_s6 = smov 104   ;;  %s3665_s17 = smov 120  }
  0xb9   : > { %s3666_s25 = smov 80   ;;  %s3668_s29 = smov 16  }
  0xba   : > { %s3669_s2 = smov 112   ;;  %s3671_s7 = smov 8  }
  0xbb   : > { %s2899_s16 = sshll.u32 %s3637_s21, 7  ;;  %s335_s0 = scalar_lea.vmem [#allocation14], %s2845_s28 }
  0xbc   : > { %v3983_v3 = vld [vmem:[#allocation2] sm:$0xff]  ;;  %s2700_s30 = sshll.u32 %s335_s0, 4  ;;  %s2686_s21 = scalar_lea.sflag [#allocation7], %s3937_s3  ;;  %s4367_s30 = int_to_ptr.vmem [resolvable:$true] %s2700_s30 }
  0xbd   : > { %v351_v4 = vpack.c.bf16 %v3983_v3, %v3983_v3  ;;  %s3551_s28 = scalar_lea.vmem %s4367_s30, 128  ;;  %p4446_p10 = scmp.ne.s32.totalorder %s4436_s11, 0 }
  0xbe   : > { %p3552_p5 = scmp.ne.s32.totalorder %s4367_s30, %s3551_s28 }
  0xbf   : > { %v3990_v5 = vsel %vm361_vm2, %v351_v4, 0 }
  0xc0   : > { %2994 = vmatpush3.bf16.msra.mxu0 %v3990_v5  ;;  %p3553_p13 = pnand %p3552_p5, %p4446_p10 }
  0xc1   : > { %3005 = vmatprep.subr.bf16.mxu0 %v3654_v0 }
  0xc2   : > { %p3554_p9 = pneg %p3553_p13 }
 0x129   : > { %v3994_v6 = vpop.permute.xlu0 %355 }
 0x12a   : > { %2996 = vmatmul.mubr.msk.bf16.vlgmr.msra.gmra.mrb[0].mxu0 %vm341_vm0, %v3994_v6  ;;  %v359_v7 = vsel %vm341_vm0, %v3994_v6, 0 }
 0x12b   : > { %3000 = vmatpush3.bf16.xpose.msra.mxu1 %v359_v7  ;;  %3007 = vmatprep.mubr.msk.bf16.mxu0 %vm3655_vm1, %v3654_v0 }
 0x12c   : > { %3011 = vmatprep.subr.bf16.mxu1 %v3654_v0 }
 0x132   : > { %3002 = vmatmul.mubr.msk.bf16.vlgmr.msra.gmra.mrb[0].mxu1 %vm341_vm0, %v3994_v6 }
 0x133   : > { %3013 = vmatprep.mubr.msk.bf16.mxu1 %vm3655_vm1, %v3654_v0 }
 0x1fd   : > { %v399_v9 = vpop.f32.mrb[0].mxu0 }
 0x1fe   : > { %406 = vrot.lane.b32.xlu0 %v399_v9, %s3658_s26  ;;  %v2997_v10 = vpop.f32.mrb[1].mxu0 }
 0x1ff   : > { %v402_v11 = vpop.f32.mrb[2].mxu0 }
 0x200   : > { %v2998_v12 = vpop.f32.mrb[3].mxu0 }
 0x205   : > { %v449_v13 = vpop.f32.mrb[0].mxu1 }
 0x206   : > { %v3003_v14 = vpop.f32.mrb[1].mxu1 }
 0x207   : > { %v452_v15 = vpop.f32.mrb[2].mxu1  ;;  %v4058_v14 = vld [vmem:[#allocation11] sm:$0xff] }
 0x208   : > { %v3004_v16 = vpop.f32.mrb[3].mxu1 }
 0x270   : > { %v407_v18 = vpop.permute.xlu0 %406 }
 0x271   : > { %v409_v19 = vsub.f32 %v4008_v17, %v407_v18 }
 0x273   : > { %411 = vrot.lane.b32.xlu1 %v409_v19, %s3659_s15  ;;  %v4061_v19 = vld [vmem:[#allocation2 + $0x8] sm:$0xff] }
 0x277   : > { %457 = vperm.xlu1 %3400, %v4008_v17  }
 0x2e5   : > { %v412_v20 = vpop.permute.xlu1 %411 }
 0x2e6   : > { %v414_v21 = vmul.f32 %v412_v20, %v4008_v17 }
 0x2e8   : > { %v464_v22 = vpack.c.bf16 %v414_v21, %v414_v21 }
 0x2ea   : > { %466 = vrot.lane.b32.xlu0 %v464_v22, %s3659_s15 }
 0x2f6   : > { %v458_v23 = vpop.permute.xlu1 %457 }
 0x2f7   : > { %v460_v24 = vmul.f32 %v458_v23, %v449_v13 }
 0x2f9   : > { %v461_v26 = vsub.f32 0.0, %v460_v24 }
 0x2fb   : > { %v462_v27 = vmul.f32 %v461_v26, %v4015_v25 }
 0x2fd   : > { %v463_v28 = vpack.c.bf16 %v462_v27, %v462_v27 }
 0x2ff   : > { %v519_v29 = vsel %vm361_vm2, %v463_v28, 0 }
 0x300   : > { %3012 = vmatpush3.bf16.msra.mxu1 %v519_v29 }
 0x301   : > { %3023 = vmatprep.subr.bf16.mxu1 %v3654_v0 }
 0x303   : > { %3014 = vmatmul.mubr.msk.bf16.vlgmr.msra.gmra.mrb[4].mxu1 %vm341_vm0, %v463_v28 }
 0x304   : > { %3025 = vmatprep.mubr.msk.bf16.mxu1 %vm3655_vm1, %v3654_v0 }
 0x35c   : > { %v467_v30 = vpop.permute.xlu0 %466 }
 0x35d   : > { %v472_v31 = vsel %vm361_vm2, %v467_v30, 0 }
 0x35e   : > { %3006 = vmatpush3.bf16.msra.mxu0 %v472_v31 }
 0x35f   : > { %3017 = vmatprep.subr.bf16.mxu0 %v3654_v0 }
 0x361   : > { %3008 = vmatmul.mubr.msk.bf16.vlgmr.msra.gmra.mrb[4].mxu0 %vm341_vm0, %v463_v28 }
 0x362   : > { %3019 = vmatprep.mubr.msk.bf16.mxu0 %vm3655_vm1, %v3654_v0 }
 0x3d6   : > { %v555_v32 = vpop.f32.mrb[4].mxu1 }
 0x3d7   : > { %v561_v33 = vpack.c.bf16 %v555_v32, %v555_v32  ;;  %v3015_v34 = vpop.f32.mrb[5].mxu1 }
 0x3d8   : > { %v558_v35 = vpop.f32.mrb[6].mxu1 }
 0x3d9   : > { %v3016_v36 = vpop.f32.mrb[7].mxu1  ;;  %v617_v37 = vsel %vm361_vm2, %v561_v33, 0 }
 0x3da   : > { %3024 = vmatpush3.bf16.msra.mxu1 %v617_v37 }
 0x3db   : > { %3035 = vmatprep.subr.bf16.mxu1 %v3654_v0 }
 0x3dd   : > { %3026 = vmatmul.mubr.msk.bf16.vlgmr.msra.gmra.mrb[8].mxu1 %vm341_vm0, %v561_v33 }
 0x3de   : > { %3037 = vmatprep.mubr.msk.bf16.mxu1 %vm3655_vm1, %v3654_v0 }
 0x3e3   : > { %3036 = vmatpush3.bf16.xpose.msra.mxu1 %v359_v7 }
 0x3e4   : > { %3053 = vmatprep.subr.bf16.mxu1 %v3654_v0 }
 0x3ea   : > { %3038 = vmatmul.mubr.msk.bf16.vlgmr.msra.gmra.mrb[12].mxu1 %vm341_vm0, %v3977_v1 }
 0x3eb   : > { %3055 = vmatprep.mubr.msk.bf16.mxu1 %vm3655_vm1, %v3654_v0 }
 0x434   : > { %v508_v38 = vpop.f32.mrb[4].mxu0 }
 0x435   : > { %515 = vrot.lane.b32.xlu1 %v508_v38, %s3656_s24  ;;  %v3009_v39 = vpop.f32.mrb[5].mxu0 }
 0x436   : > { %v511_v40 = vpop.f32.mrb[6].mxu0 }
 0x437   : > { %v3010_v41 = vpop.f32.mrb[7].mxu0 }
 0x4a7   : > { %v516_v42 = vpop.permute.xlu1 %515 }
 0x4a8   : > { %v518_v43 = vadd.f32 %v516_v42, %v414_v21 }
 0x4aa   : > { %v562_v44 = vpack.c.bf16 %v518_v43, %v518_v43 }
 0x4ac   : > { %564 = vrot.lane.b32.xlu0 %v562_v44, %s3659_s15 }
 0x4b0   : > { %v653_v45 = vpop.f32.mrb[8].mxu1 }
 0x4b1   : > { %v3027_v46 = vpop.f32.mrb[9].mxu1  ;;  %v659_v60 = vpack.c.bf16 %v653_v45, %v653_v45 }
 0x4b2   : > { %v656_v47 = vpop.f32.mrb[10].mxu1 }
 0x4b3   : > { %v3028_v48 = vpop.f32.mrb[11].mxu1 }
 0x4bd   : > { %v758_v7 = vpop.f32.mrb[12].mxu1 }
 0x4be   : > { %v3039_v8 = vpop.f32.mrb[13].mxu1  ;;  %v764_v15 = vmul.f32 %v758_v7, %v4058_v14 }
 0x4bf   : > { %v761_v9 = vpop.f32.mrb[14].mxu1 }
 0x4c0   : > { %v3040_v10 = vpop.f32.mrb[15].mxu1  ;;  %v765_v20 = vpack.c.bf16 %v764_v15, %v764_v15 }
 0x51e   : > { %v565_v49 = vpop.permute.xlu0 %564 }
 0x51f   : > { %v570_v50 = vsel %vm361_vm2, %v565_v49, 0 }
 0x520   : > { %3018 = vmatpush3.bf16.msra.mxu0 %v570_v50 }
 0x521   : > { %3029 = vmatprep.subr.bf16.mxu0 %v3654_v0 }
 0x523   : > { %3020 = vmatmul.mubr.msk.bf16.vlgmr.msra.gmra.mrb[8].mxu0 %vm341_vm0, %v561_v33 }
 0x524   : > { %3031 = vmatprep.mubr.msk.bf16.mxu0 %vm3655_vm1, %v3654_v0 }
 0x5f6   : > { %v606_v51 = vpop.f32.mrb[8].mxu0 }
 0x5f7   : > { %613 = vrot.lane.b32.xlu1 %v606_v51, %s3656_s24  ;;  %v3021_v52 = vpop.f32.mrb[9].mxu0 }
 0x5f8   : > { %v609_v53 = vpop.f32.mrb[10].mxu0 }
 0x5f9   : > { %v3022_v54 = vpop.f32.mrb[11].mxu0 }
 0x669   : > { %v614_v55 = vpop.permute.xlu1 %613 }
 0x66a   : > { %v616_v56 = vadd.f32 %v614_v55, %v518_v43 }
 0x66c   : > { %v660_v57 = vpack.c.bf16 %v616_v56, %v616_v56 }
 0x66e   : > { %662 = vrot.lane.b32.xlu0 %v660_v57, %s3659_s15 }
 0x6e0   : > { %v663_v58 = vpop.permute.xlu0 %662 }
 0x6e1   : > { %v668_v59 = vsel %vm361_vm2, %v663_v58, 0 }
 0x6e2   : > { %3030 = vmatpush3.bf16.msra.mxu0 %v668_v59 }
 0x6e3   : > { %3041 = vmatprep.subr.bf16.mxu0 %v3654_v0 }
 0x6e5   : > { %3032 = vmatmul.mubr.msk.bf16.vlgmr.msra.gmra.mrb[12].mxu0 %vm341_vm0, %v659_v60 }
 0x6e6   : > { %3043 = vmatprep.mubr.msk.bf16.mxu0 %vm3655_vm1, %v3654_v0 }
 0x7b8   : > { %v704_v61 = vpop.f32.mrb[12].mxu0 }
 0x7b9   : > { %711 = vrot.lane.b32.xlu1 %v704_v61, %s3656_s24  ;;  %v3033_v62 = vpop.f32.mrb[13].mxu0 }
 0x7ba   : > { %v707_v63 = vpop.f32.mrb[14].mxu0 }
 0x7bb   : > { %v3034_v4 = vpop.f32.mrb[15].mxu0 }
 0x7bd   : > { %919 = vrot.lane.b32.xlu1 %v3981_v2, %s3660_s10 }
 0x82b   : > { %v712_v11 = vpop.permute.xlu1 %711 }
 0x82c   : > { %v714_v12 = vadd.f32 %v712_v11, %v616_v56 }
 0x82e   : > { %716 = vrot.lane.b32.xlu0 %v714_v12, %s3659_s15 }
 0x82f   : > { %v4081_v24 = vpop.permute.xlu1 %919 }
 0x84c   : > { %855 = vxpose.xlu0.c.b16.start.end [1/1] (short) (narrow) %v3994_v6, 16  ;;  %v918_v6 = vpack.c.bf16 %v4061_v19, %v4061_v19 }
 0x84e   : > { %v4073_v22 = vsel %vm361_vm2, %v918_v6, 0 }
 0x8a0   : > { %v717_v13 = vpop.permute.xlu0 %716 }
 0x8a1   : > { %719 = vst.msk [vmem:[#allocation4] sm:$0xff] %vm341_vm0, %v717_v13 }
 0x8a8   : > { %v720_v16 = vld [vmem:[#allocation4] sm:$0xff] }
 0x8a9   : > { %v766_v18 = vpack.c.bf16 %v720_v16, %v720_v16 }
 0x8ab   : > { %v771_v21 = vsel %vm361_vm2, %v766_v18, 0 }
 0x8ac   : > { %3042 = vmatpush3.bf16.msra.mxu0 %v771_v21  ;;  %3054 = vmatpush3.bf16.msra.mxu1 %v771_v21 }
 0x8ad   : > { %3047 = vmatprep.subr.bf16.mxu0 %v3654_v0  ;;  %3059 = vmatprep.subr.bf16.mxu1 %v3654_v0 }
 0x8af   : > { %3044 = vmatmul.mubr.msk.bf16.vlgmr.msra.gmra.mrb[16].mxu0 %vm341_vm0, %v765_v20 }
 0x8b0   : > { %3048 = vmatpush3.bf16.msra.mxu0 %v3990_v5  ;;  %3049 = vmatprep.mubr.msk.bf16.mxu0 %vm3655_vm1, %v3654_v0  ;;  %v4085_v5 = vsel %vm341_vm0, %v4081_v24, 0 }
 0x8b1   : > { %3065 = vmatprep.subr.bf16.mxu0 %v3654_v0 }
 0x8b2   : > { %v863_v23 = vpop.trf.xlu0 }
 0x8b3   : > { %3056 = vmatmul.mubr.msk.bf16.vlgmr.msra.gmra.mrb[16].mxu1 %vm341_vm0, %v863_v23 }
 0x8b4   : > { %3060 = vmatpush3.bf16.msra.mxu1 %v4073_v22  ;;  %3061 = vmatprep.mubr.msk.bf16.mxu1 %vm3655_vm1, %v3654_v0 }
 0x8b5   : > { %3071 = vmatprep.subr.bf16.mxu1 %v3654_v0 }
 0x8bb   : > { %3050 = vmatmul.mubr.msk.bf16.vlgmr.msra.gmra.mrb[16].mxu0 %vm341_vm0, %v3977_v1  ;;  %3062 = vmatmul.mubr.msk.bf16.vlgmr.msra.gmra.mrb[20].mxu1 %vm341_vm0, %v4081_v24  ;;  %v3661_v1 = vmov 104  }
 0x8bc   : > { %3066 = vmatpush3.bf16.xpose.msra.mxu0 %v4085_v5  ;;  %3067 = vmatprep.mubr.msk.bf16.mxu0 %vm3655_vm1, %v3654_v0 }
 0x8bd   : > { %3077 = vmatprep.subr.bf16.mxu0 %v3654_v0  ;;  %3073 = vmatprep.mubr.msk.bf16.mxu1 %vm3655_vm1, %v3654_v0 }
 0x8be   : > { %3401 = vset.pattern.permute.xlu1 %v3661_v1 }
 0x8c3   : > { %3068 = vmatmul.mubr.msk.bf16.vlgmr.msra.gmra.mrb[20].mxu0 %vm341_vm0, %v4081_v24 }
 0x8c4   : > { %3079 = vmatprep.mubr.msk.bf16.mxu0 %vm3655_vm1, %v3654_v0 }
 0x986   : > { %v908_v26 = vpop.f32.mrb[16].mxu1 }
 0x987   : > { %v914_v27 = vadd.f32 %v908_v26, %v3983_v3  ;;  %v3057_v28 = vpop.f32.mrb[17].mxu1 }
 0x988   : > { %v911_v29 = vpop.f32.mrb[18].mxu1 }
 0x989   : > { %915 = vst.msk [vmem:[#allocation2] sm:$0xff] %vm341_vm0, %v914_v27  ;;  %v3058_v30 = vpop.f32.mrb[19].mxu1 }
 0x98e   : > { %v961_v31 = vpop.f32.mrb[20].mxu1  ;;  %v847_v32 = vpop.f32.mrb[16].mxu0 }
 0x98f   : > { %968 = vrot.lane.b32.xlu1 %v961_v31, %s3662_s8  ;;  %v3063_v33 = vpop.f32.mrb[21].mxu1  ;;  %853 = vst.msk [vmem:[#allocation3] sm:$0xff] %vm341_vm0, %v847_v32  ;;  %v3051_v34 = vpop.f32.mrb[17].mxu0 }
 0x990   : > { %v964_v35 = vpop.f32.mrb[22].mxu1  ;;  %v850_v36 = vpop.f32.mrb[18].mxu0 }
 0x991   : > { %v3064_v37 = vpop.f32.mrb[23].mxu1  ;;  %v3052_v38 = vpop.f32.mrb[19].mxu0 }
 0x996   : > { %v1011_v39 = vpop.f32.mrb[20].mxu0 }
 0x997   : > { %v3069_v3 = vpop.f32.mrb[21].mxu0 }
 0x998   : > { %v1014_v40 = vpop.f32.mrb[22].mxu0 }
 0x999   : > { %v3070_v41 = vpop.f32.mrb[23].mxu0 }
 0xa01   : > { %v969_v42 = vpop.permute.xlu1 %968 }
 0xa02   : > { %v971_v43 = vsub.f32 %v4008_v17, %v969_v42 }
 0xa04   : > { %973 = vrot.lane.b32.xlu1 %v971_v43, %s3659_s15 }
 0xa08   : > { %1018 = vperm.xlu1 %3401, %v4008_v17  }
 0xa76   : > { %v974_v44 = vpop.permute.xlu1 %973 }
 0xa77   : > { %v976_v45 = vmul.f32 %v974_v44, %v4008_v17 }
 0xa79   : > { %v1025_v46 = vpack.c.bf16 %v976_v45, %v976_v45 }
 0xa7b   : > { %1027 = vrot.lane.b32.xlu1 %v1025_v46, %s3663_s13 }
 0xa87   : > { %v1019_v47 = vpop.permute.xlu1 %1018 }
 0xa88   : > { %v1021_v48 = vmul.f32 %v1019_v47, %v1011_v39 }
 0xa8a   : > { %v1022_v49 = vsub.f32 0.0, %v1021_v48 }
 0xa8c   : > { %v1023_v50 = vmul.f32 %v1022_v49, %v4015_v25 }
 0xa8e   : > { %v1024_v51 = vpack.c.bf16 %v1023_v50, %v1023_v50 }
 0xa90   : > { %v1080_v52 = vsel %vm361_vm2, %v1024_v51, 0 }
 0xa91   : > { %3078 = vmatpush3.bf16.msra.mxu0 %v1080_v52 }
 0xa92   : > { %3089 = vmatprep.subr.bf16.mxu0 %v3654_v0 }
 0xa94   : > { %3080 = vmatmul.mubr.msk.bf16.vlgmr.msra.gmra.mrb[24].mxu0 %vm341_vm0, %v1024_v51 }
 0xa95   : > { %3091 = vmatprep.mubr.msk.bf16.mxu0 %vm3655_vm1, %v3654_v0 }
 0xaed   : > { %v1028_v53 = vpop.permute.xlu1 %1027 }
 0xaee   : > { %v1033_v54 = vsel %vm361_vm2, %v1028_v53, 0 }
 0xaef   : > { %3072 = vmatpush3.bf16.msra.mxu1 %v1033_v54 }
 0xaf0   : > { %3083 = vmatprep.subr.bf16.mxu1 %v3654_v0 }
 0xaf2   : > { %3074 = vmatmul.mubr.msk.bf16.vlgmr.msra.gmra.mrb[24].mxu1 %vm341_vm0, %v1024_v51 }
 0xaf3   : > { %3085 = vmatprep.mubr.msk.bf16.mxu1 %vm3655_vm1, %v3654_v0 }
 0xb67   : > { %v1116_v55 = vpop.f32.mrb[24].mxu0 }
 0xb68   : > { %v1122_v56 = vpack.c.bf16 %v1116_v55, %v1116_v55  ;;  %v3081_v57 = vpop.f32.mrb[25].mxu0 }
 0xb69   : > { %v1119_v58 = vpop.f32.mrb[26].mxu0 }
 0xb6a   : > { %v3082_v59 = vpop.f32.mrb[27].mxu0  ;;  %v1178_v60 = vsel %vm361_vm2, %v1122_v56, 0 }
 0xb6b   : > { %3090 = vmatpush3.bf16.msra.mxu0 %v1178_v60 }
 0xb6c   : > { %3101 = vmatprep.subr.bf16.mxu0 %v3654_v0 }
 0xb6e   : > { %3092 = vmatmul.mubr.msk.bf16.vlgmr.msra.gmra.mrb[28].mxu0 %vm341_vm0, %v1122_v56 }
 0xb6f   : > { %3103 = vmatprep.mubr.msk.bf16.mxu0 %vm3655_vm1, %v3654_v0 }
 0xb74   : > { %3102 = vmatpush3.bf16.xpose.msra.mxu0 %v4085_v5 }
 0xb75   : > { %3119 = vmatprep.subr.bf16.mxu0 %v3654_v0 }
 0xbc5   : > { %v1069_v61 = vpop.f32.mrb[24].mxu1 }
 0xbc6   : > { %1076 = vrot.lane.b32.xlu1 %v1069_v61, %s3664_s6  ;;  %v3075_v62 = vpop.f32.mrb[25].mxu1 }
 0xbc7   : > { %v1072_v63 = vpop.f32.mrb[26].mxu1 }
 0xbc8   : > { %v3076_v4 = vpop.f32.mrb[27].mxu1 }
 0xc38   : > { %v1077_v7 = vpop.permute.xlu1 %1076 }
 0xc39   : > { %v1079_v8 = vadd.f32 %v1077_v7, %v976_v45  ;;  %v4158_v45 = vld [vmem:[#allocation2 + $0x10] sm:$0xff] }
 0xc3b   : > { %v1123_v9 = vpack.c.bf16 %v1079_v8, %v1079_v8 }
 0xc3d   : > { %1125 = vrot.lane.b32.xlu1 %v1123_v9, %s3663_s13 }
 0xc41   : > { %v1214_v10 = vpop.f32.mrb[28].mxu0 }
 0xc42   : > { %v3093_v11 = vpop.f32.mrb[29].mxu0  ;;  %v1220_v28 = vpack.c.bf16 %v1214_v10, %v1214_v10 }
 0xc43   : > { %v1217_v12 = vpop.f32.mrb[30].mxu0 }
 0xc44   : > { %v3094_v13 = vpop.f32.mrb[31].mxu0 }
 0xcaf   : > { %v1126_v15 = vpop.permute.xlu1 %1125 }
 0xcb0   : > { %v1131_v16 = vsel %vm361_vm2, %v1126_v15, 0 }
 0xcb1   : > { %3084 = vmatpush3.bf16.msra.mxu1 %v1131_v16 }
 0xcb2   : > { %3095 = vmatprep.subr.bf16.mxu1 %v3654_v0 }
 0xcb4   : > { %3086 = vmatmul.mubr.msk.bf16.vlgmr.msra.gmra.mrb[28].mxu1 %vm341_vm0, %v1122_v56 }
 0xcb5   : > { %3097 = vmatprep.mubr.msk.bf16.mxu1 %vm3655_vm1, %v3654_v0 }
 0xd87   : > { %v1167_v18 = vpop.f32.mrb[28].mxu1 }
 0xd88   : > { %1174 = vrot.lane.b32.xlu1 %v1167_v18, %s3664_s6  ;;  %v3087_v20 = vpop.f32.mrb[29].mxu1 }
 0xd89   : > { %v1170_v21 = vpop.f32.mrb[30].mxu1 }
 0xd8a   : > { %v3088_v6 = vpop.f32.mrb[31].mxu1 }
 0xdfa   : > { %v1175_v23 = vpop.permute.xlu1 %1174 }
 0xdfb   : > { %v1177_v5 = vadd.f32 %v1175_v23, %v1079_v8 }
 0xdfd   : > { %v1221_v1 = vpack.c.bf16 %v1177_v5, %v1177_v5 }
 0xdff   : > { %1223 = vrot.lane.b32.xlu1 %v1221_v1, %s3663_s13 }
 0xe03   : > { %1282 = vrot.lane.b32.xlu1 %v3981_v2, %s3665_s17 }
 0xe71   : > { %v1224_v26 = vpop.permute.xlu1 %1223 }
 0xe72   : > { %v1229_v27 = vsel %vm361_vm2, %v1224_v26, 0 }
 0xe73   : > { %3096 = vmatpush3.bf16.msra.mxu1 %v1229_v27 }
 0xe74   : > { %3107 = vmatprep.subr.bf16.mxu1 %v3654_v0 }
 0xe75   : > { %v1283_v29 = vpop.permute.xlu1 %1282 }
 0xe76   : > { %3098 = vmatmul.mubr.msk.bf16.vlgmr.msra.gmra.mrb[32].mxu1 %vm341_vm0, %v1220_v28  ;;  %3104 = vmatmul.mubr.msk.bf16.vlgmr.msra.gmra.mrb[32].mxu0 %vm341_vm0, %v1283_v29 }
 0xe77   : > { %3109 = vmatprep.mubr.msk.bf16.mxu1 %vm3655_vm1, %v3654_v0  ;;  %3121 = vmatprep.mubr.msk.bf16.mxu0 %vm3655_vm1, %v3654_v0 }
 0xf49   : > { %v1265_v30 = vpop.f32.mrb[32].mxu1  ;;  %v1321_v34 = vpop.f32.mrb[32].mxu0 }
 0xf4a   : > { %1272 = vrot.lane.b32.xlu0 %v1265_v30, %s3664_s6  ;;  %v3099_v31 = vpop.f32.mrb[33].mxu1  ;;  %v3105_v35 = vpop.f32.mrb[33].mxu0  ;;  %v1327_v40 = vmul.f32 %v1321_v34, %v4058_v14 }
 0xf4b   : > { %v1268_v32 = vpop.f32.mrb[34].mxu1  ;;  %v1324_v36 = vpop.f32.mrb[34].mxu0 }
 0xf4c   : > { %v3100_v33 = vpop.f32.mrb[35].mxu1  ;;  %v3106_v37 = vpop.f32.mrb[35].mxu0  ;;  %v1328_v43 = vpack.c.bf16 %v1327_v40, %v1327_v40 }
 0xf4e   : > { %1487 = vrot.lane.b32.xlu0 %v3981_v2, %s3666_s25 }
 0xfbc   : > { %v1273_v38 = vpop.permute.xlu0 %1272 }
 0xfbd   : > { %v1275_v39 = vadd.f32 %v1273_v38, %v1177_v5 }
 0xfbf   : > { %1277 = vrot.lane.b32.xlu1 %v1275_v39, %s3663_s13 }
 0xfc0   : > { %v4166_v46 = vpop.permute.xlu0 %1487 }
 0xfc1   : > { %v4174_v49 = vsel %vm341_vm0, %v4166_v46, 0 }
 0xfe2   : > { %1423 = vxpose.xlu1.c.b16.start.end [1/1] (short) (narrow) %v4081_v24, 16  ;;  %v1486_v24 = vpack.c.bf16 %v4158_v45, %v4158_v45 }
 0xfe4   : > { %v4169_v47 = vsel %vm361_vm2, %v1486_v24, 0 }
0x1031   : > { %v1278_v3 = vpop.permute.xlu1 %1277 }
0x1032   : > { %1280 = vst.msk [vmem:[#allocation4] sm:$0xff] %vm341_vm0, %v1278_v3 }
0x1039   : > { %v1281_v41 = vld [vmem:[#allocation4] sm:$0xff] }
0x103a   : > { %v1329_v42 = vpack.c.bf16 %v1281_v41, %v1281_v41 }
0x103c   : > { %v1334_v44 = vsel %vm361_vm2, %v1329_v42, 0 }
0x103d   : > { %3108 = vmatpush3.bf16.msra.mxu1 %v1334_v44  ;;  %3120 = vmatpush3.bf16.msra.mxu0 %v1334_v44 }
0x103e   : > { %3113 = vmatprep.subr.bf16.mxu1 %v3654_v0  ;;  %3125 = vmatprep.subr.bf16.mxu0 %v3654_v0 }
0x1040   : > { %3110 = vmatmul.mubr.msk.bf16.vlgmr.msra.gmra.mrb[36].mxu1 %vm341_vm0, %v1328_v43 }
0x1041   : > { %3114 = vmatpush3.bf16.msra.mxu1 %v4073_v22  ;;  %3115 = vmatprep.mubr.msk.bf16.mxu1 %vm3655_vm1, %v3654_v0  ;;  %v3667_v22 = vmov 112  }
0x1042   : > { %3131 = vmatprep.subr.bf16.mxu1 %v3654_v0  ;;  %3402 = vset.pattern.permute.xlu0 %v3667_v22 }
0x1048   : > { %v1431_v48 = vpop.trf.xlu1 }
0x1049   : > { %3122 = vmatmul.mubr.msk.bf16.vlgmr.msra.gmra.mrb[36].mxu0 %vm341_vm0, %v1431_v48 }
0x104a   : > { %3126 = vmatpush3.bf16.msra.mxu0 %v4169_v47  ;;  %3127 = vmatprep.mubr.msk.bf16.mxu0 %vm3655_vm1, %v3654_v0 }
0x104b   : > { %3137 = vmatprep.subr.bf16.mxu0 %v3654_v0 }
0x104c   : > { %3116 = vmatmul.mubr.msk.bf16.vlgmr.msra.gmra.mrb[36].mxu1 %vm341_vm0, %v1283_v29 }
0x104d   : > { %3132 = vmatpush3.bf16.xpose.msra.mxu1 %v4174_v49  ;;  %3133 = vmatprep.mubr.msk.bf16.mxu1 %vm3655_vm1, %v3654_v0 }
0x104e   : > { %3143 = vmatprep.subr.bf16.mxu1 %v3654_v0 }
0x1051   : > { %3128 = vmatmul.mubr.msk.bf16.vlgmr.msra.gmra.mrb[40].mxu0 %vm341_vm0, %v4166_v46 }
0x1052   : > { %3139 = vmatprep.mubr.msk.bf16.mxu0 %vm3655_vm1, %v3654_v0 }
0x1054   : > { %3134 = vmatmul.mubr.msk.bf16.vlgmr.msra.gmra.mrb[40].mxu1 %vm341_vm0, %v4166_v46 }
0x1055   : > { %3145 = vmatprep.mubr.msk.bf16.mxu1 %vm3655_vm1, %v3654_v0 }
0x111c   : > { %v1476_v50 = vpop.f32.mrb[36].mxu0 }
0x111d   : > { %v1482_v51 = vadd.f32 %v1476_v50, %v4061_v19  ;;  %v3123_v52 = vpop.f32.mrb[37].mxu0 }
0x111e   : > { %v1479_v53 = vpop.f32.mrb[38].mxu0 }
0x111f   : > { %1483 = vst.msk [vmem:[#allocation2 + $0x8] sm:$0xff] %vm341_vm0, %v1482_v51  ;;  %v4195_v54 = vpop.f32.mrb[36].mxu1  ;;  %v3124_v55 = vpop.f32.mrb[39].mxu0 }
0x1120   : > { %v3117_v56 = vpop.f32.mrb[37].mxu1 }
0x1121   : > { %v1413_v57 = vpop.f32.mrb[38].mxu1 }
0x1122   : > { %v3118_v58 = vpop.f32.mrb[39].mxu1 }
0x1124   : > { %v1529_v59 = vpop.f32.mrb[40].mxu0 }
0x1125   : > { %1536 = vrot.lane.b32.xlu0 %v1529_v59, %s3666_s25  ;;  %v3129_v60 = vpop.f32.mrb[41].mxu0 }
0x1126   : > { %v1532_v61 = vpop.f32.mrb[42].mxu0 }
0x1127   : > { %v3130_v62 = vpop.f32.mrb[43].mxu0  ;;  %v1579_v63 = vpop.f32.mrb[40].mxu1 }
0x1128   : > { %v3135_v4 = vpop.f32.mrb[41].mxu1 }
0x1129   : > { %v1582_v7 = vpop.f32.mrb[42].mxu1 }
0x112a   : > { %v3136_v19 = vpop.f32.mrb[43].mxu1 }
0x1197   : > { %v1537_v8 = vpop.permute.xlu0 %1536 }
0x1198   : > { %v1539_v9 = vsub.f32 %v4008_v17, %v1537_v8 }
0x119a   : > { %1541 = vrot.lane.b32.xlu0 %v1539_v9, %s3659_s15 }
0x119e   : > { %1586 = vperm.xlu0 %3402, %v4008_v17  }
0x120c   : > { %v1542_v10 = vpop.permute.xlu0 %1541 }
0x120d   : > { %v1544_v11 = vmul.f32 %v1542_v10, %v4008_v17 }
0x120f   : > { %v1593_v12 = vpack.c.bf16 %v1544_v11, %v1544_v11 }
0x1211   : > { %1595 = vrot.lane.b32.xlu0 %v1593_v12, %s3668_s29  ;;  %v4251_v12 = vld [vmem:[#allocation2 + $0x18] sm:$0xff] }
0x121d   : > { %v1587_v13 = vpop.permute.xlu0 %1586 }
0x121e   : > { %v1589_v15 = vmul.f32 %v1587_v13, %v1579_v63 }
0x1220   : > { %v1590_v16 = vsub.f32 0.0, %v1589_v15 }
0x1222   : > { %v1591_v18 = vmul.f32 %v1590_v16, %v4015_v25 }
0x1224   : > { %v1592_v20 = vpack.c.bf16 %v1591_v18, %v1591_v18 }
0x1226   : > { %v1648_v21 = vsel %vm361_vm2, %v1592_v20, 0 }
0x1227   : > { %3144 = vmatpush3.bf16.msra.mxu1 %v1648_v21 }
0x1228   : > { %3155 = vmatprep.subr.bf16.mxu1 %v3654_v0 }
0x122a   : > { %3146 = vmatmul.mubr.msk.bf16.vlgmr.msra.gmra.mrb[44].mxu1 %vm341_vm0, %v1592_v20 }
0x122b   : > { %3157 = vmatprep.mubr.msk.bf16.mxu1 %vm3655_vm1, %v3654_v0 }
0x1283   : > { %v1596_v6 = vpop.permute.xlu0 %1595 }
0x1284   : > { %v1601_v23 = vsel %vm361_vm2, %v1596_v6, 0 }
0x1285   : > { %3138 = vmatpush3.bf16.msra.mxu0 %v1601_v23 }
0x1286   : > { %3149 = vmatprep.subr.bf16.mxu0 %v3654_v0 }
0x1288   : > { %3140 = vmatmul.mubr.msk.bf16.vlgmr.msra.gmra.mrb[44].mxu0 %vm341_vm0, %v1592_v20 }
0x1289   : > { %3151 = vmatprep.mubr.msk.bf16.mxu0 %vm3655_vm1, %v3654_v0 }
0x12fd   : > { %v1684_v5 = vpop.f32.mrb[44].mxu1 }
0x12fe   : > { %v1690_v1 = vpack.c.bf16 %v1684_v5, %v1684_v5  ;;  %v3147_v26 = vpop.f32.mrb[45].mxu1 }
0x12ff   : > { %v1687_v27 = vpop.f32.mrb[46].mxu1 }
0x1300   : > { %v3148_v28 = vpop.f32.mrb[47].mxu1  ;;  %v1746_v29 = vsel %vm361_vm2, %v1690_v1, 0 }
0x1301   : > { %3156 = vmatpush3.bf16.msra.mxu1 %v1746_v29 }
0x1302   : > { %3167 = vmatprep.subr.bf16.mxu1 %v3654_v0 }
0x1304   : > { %3158 = vmatmul.mubr.msk.bf16.vlgmr.msra.gmra.mrb[48].mxu1 %vm341_vm0, %v1690_v1 }
0x1305   : > { %3169 = vmatprep.mubr.msk.bf16.mxu1 %vm3655_vm1, %v3654_v0 }
0x130a   : > { %3168 = vmatpush3.bf16.xpose.msra.mxu1 %v4174_v49 }
0x130b   : > { %3185 = vmatprep.subr.bf16.mxu1 %v3654_v0 }
0x135b   : > { %v1637_v30 = vpop.f32.mrb[44].mxu0 }
0x135c   : > { %1644 = vrot.lane.b32.xlu0 %v1637_v30, %s3669_s2  ;;  %v3141_v31 = vpop.f32.mrb[45].mxu0 }
0x135d   : > { %v1640_v32 = vpop.f32.mrb[46].mxu0 }
0x135e   : > { %v3142_v33 = vpop.f32.mrb[47].mxu0 }
0x13ce   : > { %v1645_v34 = vpop.permute.xlu0 %1644 }
0x13cf   : > { %v1647_v35 = vadd.f32 %v1645_v34, %v1544_v11 }
0x13d1   : > { %v1691_v36 = vpack.c.bf16 %v1647_v35, %v1647_v35 }
0x13d3   : > { %1693 = vrot.lane.b32.xlu0 %v1691_v36, %s3668_s29 }
0x13d7   : > { %v1782_v37 = vpop.f32.mrb[48].mxu1 }
0x13d8   : > { %v3159_v38 = vpop.f32.mrb[49].mxu1  ;;  %v1788_v52 = vpack.c.bf16 %v1782_v37, %v1782_v37 }
0x13d9   : > { %v1785_v39 = vpop.f32.mrb[50].mxu1 }
0x13da   : > { %v3160_v3 = vpop.f32.mrb[51].mxu1 }
0x1445   : > { %v1694_v40 = vpop.permute.xlu0 %1693 }
0x1446   : > { %v1699_v41 = vsel %vm361_vm2, %v1694_v40, 0 }
0x1447   : > { %3150 = vmatpush3.bf16.msra.mxu0 %v1699_v41 }
0x1448   : > { %3161 = vmatprep.subr.bf16.mxu0 %v3654_v0 }
0x144a   : > { %3152 = vmatmul.mubr.msk.bf16.vlgmr.msra.gmra.mrb[48].mxu0 %vm341_vm0, %v1690_v1 }
0x144b   : > { %3163 = vmatprep.mubr.msk.bf16.mxu0 %vm3655_vm1, %v3654_v0 }
0x151d   : > { %v1735_v42 = vpop.f32.mrb[48].mxu0 }
0x151e   : > { %1742 = vrot.lane.b32.xlu0 %v1735_v42, %s3669_s2  ;;  %v3153_v43 = vpop.f32.mrb[49].mxu0 }
0x151f   : > { %v1738_v44 = vpop.f32.mrb[50].mxu0 }
0x1520   : > { %v3154_v24 = vpop.f32.mrb[51].mxu0 }
0x1590   : > { %v1743_v48 = vpop.permute.xlu0 %1742 }
0x1591   : > { %v1745_v49 = vadd.f32 %v1743_v48, %v1647_v35 }
0x1593   : > { %v1789_v22 = vpack.c.bf16 %v1745_v49, %v1745_v49 }
0x1595   : > { %1791 = vrot.lane.b32.xlu0 %v1789_v22, %s3668_s29 }
0x1599   : > { %1850 = vrot.lane.b32.xlu0 %v3981_v2, %s3669_s2 }
0x159d   : > { %2055 = vrot.lane.b32.xlu0 %v3981_v2, %s3662_s8 }
0x1607   : > { %v1792_v50 = vpop.permute.xlu0 %1791 }
0x1608   : > { %v1797_v51 = vsel %vm361_vm2, %v1792_v50, 0 }
0x1609   : > { %3162 = vmatpush3.bf16.msra.mxu0 %v1797_v51 }
0x160a   : > { %3173 = vmatprep.subr.bf16.mxu0 %v3654_v0 }
0x160b   : > { %v1851_v53 = vpop.permute.xlu0 %1850 }
0x160c   : > { %3164 = vmatmul.mubr.msk.bf16.vlgmr.msra.gmra.mrb[52].mxu0 %vm341_vm0, %v1788_v52  ;;  %3170 = vmatmul.mubr.msk.bf16.vlgmr.msra.gmra.mrb[52].mxu1 %vm341_vm0, %v1851_v53 }
0x160d   : > { %3175 = vmatprep.mubr.msk.bf16.mxu0 %vm3655_vm1, %v3654_v0  ;;  %3187 = vmatprep.mubr.msk.bf16.mxu1 %vm3655_vm1, %v3654_v0 }
0x160f   : > { %v4259_v13 = vpop.permute.xlu0 %2055 }
0x1610   : > { %v4267_v18 = vsel %vm341_vm0, %v4259_v13, 0 }
0x16df   : > { %v1833_v55 = vpop.f32.mrb[52].mxu0  ;;  %v1889_v59 = vpop.f32.mrb[52].mxu1 }
0x16e0   : > { %1840 = vrot.lane.b32.xlu1 %v1833_v55, %s3669_s2  ;;  %v3165_v56 = vpop.f32.mrb[53].mxu0  ;;  %v3171_v60 = vpop.f32.mrb[53].mxu1  ;;  %v1895_v19 = vmul.f32 %v1889_v59, %v4058_v14 }
0x16e1   : > { %v1836_v57 = vpop.f32.mrb[54].mxu0  ;;  %v1892_v61 = vpop.f32.mrb[54].mxu1 }
0x16e2   : > { %v3166_v58 = vpop.f32.mrb[55].mxu0  ;;  %v3172_v62 = vpop.f32.mrb[55].mxu1  ;;  %v1896_v10 = vpack.c.bf16 %v1895_v19, %v1895_v19 }
0x1752   : > { %v1841_v63 = vpop.permute.xlu1 %1840 }
0x1753   : > { %v1843_v4 = vadd.f32 %v1841_v63, %v1745_v49 }
0x1755   : > { %1845 = vrot.lane.b32.xlu1 %v1843_v4, %s3668_s29 }
0x1778   : > { %1991 = vxpose.xlu1.c.b16.start.end [1/1] (short) (narrow) %v4166_v46, 16  ;;  %v2054_v46 = vpack.c.bf16 %v4251_v12, %v4251_v12 }
0x177a   : > { %v4262_v15 = vsel %vm361_vm2, %v2054_v46, 0 }
0x17c7   : > { %v1846_v7 = vpop.permute.xlu1 %1845 }
0x17c8   : > { %1848 = vst.msk [vmem:[#allocation4] sm:$0xff] %vm341_vm0, %v1846_v7 }
0x17cf   : > { %v1849_v8 = vld [vmem:[#allocation4] sm:$0xff] }
0x17d0   : > { %v1897_v9 = vpack.c.bf16 %v1849_v8, %v1849_v8 }
0x17d2   : > { %v1902_v11 = vsel %vm361_vm2, %v1897_v9, 0 }
0x17d3   : > { %3174 = vmatpush3.bf16.msra.mxu0 %v1902_v11  ;;  %3186 = vmatpush3.bf16.msra.mxu1 %v1902_v11 }
0x17d4   : > { %3179 = vmatprep.subr.bf16.mxu0 %v3654_v0  ;;  %3191 = vmatprep.subr.bf16.mxu1 %v3654_v0 }
0x17d6   : > { %3176 = vmatmul.mubr.msk.bf16.vlgmr.msra.gmra.mrb[56].mxu0 %vm341_vm0, %v1896_v10 }
0x17d7   : > { %3180 = vmatpush3.bf16.msra.mxu0 %v4169_v47  ;;  %3181 = vmatprep.mubr.msk.bf16.mxu0 %vm3655_vm1, %v3654_v0  ;;  %v3670_v47 = vmov 120  }
0x17d8   : > { %3197 = vmatprep.subr.bf16.mxu0 %v3654_v0  ;;  %3403 = vset.pattern.permute.xlu0 %v3670_v47 }
0x17de   : > { %v1999_v16 = vpop.trf.xlu1 }
0x17df   : > { %3188 = vmatmul.mubr.msk.bf16.vlgmr.msra.gmra.mrb[56].mxu1 %vm341_vm0, %v1999_v16 }
0x17e0   : > { %3192 = vmatpush3.bf16.msra.mxu1 %v4262_v15  ;;  %3193 = vmatprep.mubr.msk.bf16.mxu1 %vm3655_vm1, %v3654_v0 }
0x17e1   : > { %3203 = vmatprep.subr.bf16.mxu1 %v3654_v0 }
0x17e2   : > { %3182 = vmatmul.mubr.msk.bf16.vlgmr.msra.gmra.mrb[56].mxu0 %vm341_vm0, %v1851_v53 }
0x17e3   : > { %3198 = vmatpush3.bf16.xpose.msra.mxu0 %v4267_v18  ;;  %3199 = vmatprep.mubr.msk.bf16.mxu0 %vm3655_vm1, %v3654_v0 }
0x17e4   : > { %3209 = vmatprep.subr.bf16.mxu0 %v3654_v0 }
0x17e7   : > { %3194 = vmatmul.mubr.msk.bf16.vlgmr.msra.gmra.mrb[60].mxu1 %vm341_vm0, %v4259_v13 }
0x17e8   : > { %3205 = vmatprep.mubr.msk.bf16.mxu1 %vm3655_vm1, %v3654_v0 }
0x17ea   : > { %3200 = vmatmul.mubr.msk.bf16.vlgmr.msra.gmra.mrb[60].mxu0 %vm341_vm0, %v4259_v13 }
0x17eb   : > { %3211 = vmatprep.mubr.msk.bf16.mxu0 %vm3655_vm1, %v3654_v0 }
0x18b2   : > { %v2044_v20 = vpop.f32.mrb[56].mxu1 }
0x18b3   : > { %v2050_v21 = vadd.f32 %v2044_v20, %v4158_v45  ;;  %v3189_v6 = vpop.f32.mrb[57].mxu1 }
0x18b4   : > { %v2047_v23 = vpop.f32.mrb[58].mxu1 }
0x18b5   : > { %2051 = vst.msk [vmem:[#allocation2 + $0x10] sm:$0xff] %vm341_vm0, %v2050_v21  ;;  %v4288_v5 = vpop.f32.mrb[56].mxu0  ;;  %v3190_v1 = vpop.f32.mrb[59].mxu1 }
0x18b6   : > { %v3183_v26 = vpop.f32.mrb[57].mxu0 }
0x18b7   : > { %v1981_v27 = vpop.f32.mrb[58].mxu0 }
0x18b8   : > { %v3184_v28 = vpop.f32.mrb[59].mxu0 }
0x18ba   : > { %v2097_v29 = vpop.f32.mrb[60].mxu1 }
0x18bb   : > { %2104 = vrot.lane.b32.xlu0 %v2097_v29, %s3660_s10  ;;  %v3195_v30 = vpop.f32.mrb[61].mxu1 }
0x18bc   : > { %v2100_v31 = vpop.f32.mrb[62].mxu1 }
0x18bd   : > { %v3196_v32 = vpop.f32.mrb[63].mxu1  ;;  %v2147_v33 = vpop.f32.mrb[60].mxu0 }
0x18be   : > { %v3201_v34 = vpop.f32.mrb[61].mxu0 }
0x18bf   : > { %v2150_v35 = vpop.f32.mrb[62].mxu0 }
0x18c0   : > { %v3202_v45 = vpop.f32.mrb[63].mxu0 }
0x192d   : > { %v2105_v36 = vpop.permute.xlu0 %2104 }
0x192e   : > { %v2107_v37 = vsub.f32 %v4008_v17, %v2105_v36 }
0x1930   : > { %2109 = vrot.lane.b32.xlu0 %v2107_v37, %s3659_s15  ;;  %s4365_s15 = scalar_lea.hbm %s4420_s5, %s2899_s16 }
0x1934   : > { %2154 = vperm.xlu0 %3403, %v4008_v17  }
0x19a2   : > { %v2110_v38 = vpop.permute.xlu0 %2109 }
0x19a3   : > { %v2112_v39 = vmul.f32 %v2110_v38, %v4008_v17 }
0x19a5   : > { %v2161_v3 = vpack.c.bf16 %v2112_v39, %v2112_v39 }
0x19a7   : > { %2163 = vrot.lane.b32.xlu0 %v2161_v3, %s3671_s7 }
0x19b3   : > { %v2155_v40 = vpop.permute.xlu0 %2154 }
0x19b4   : > { %v2157_v41 = vmul.f32 %v2155_v40, %v2147_v33 }
0x19b6   : > { %v2158_v42 = vsub.f32 0.0, %v2157_v41 }
0x19b8   : > { %v2159_v43 = vmul.f32 %v2158_v42, %v4015_v25 }
0x19ba   : > { %v2160_v44 = vpack.c.bf16 %v2159_v43, %v2159_v43 }
0x19bc   : > { %v2216_v24 = vsel %vm361_vm2, %v2160_v44, 0 }
0x19bd   : > { %3210 = vmatpush3.bf16.msra.mxu0 %v2216_v24 }
0x19be   : > { %3221 = vmatprep.subr.bf16.mxu0 %v3654_v0 }
0x19c0   : > { %3212 = vmatmul.mubr.msk.bf16.vlgmr.msra.gmra.mrb[64].mxu0 %vm341_vm0, %v2160_v44 }
0x19c1   : > { %3223 = vmatprep.mubr.msk.bf16.mxu0 %vm3655_vm1, %v3654_v0 }
0x1a19   : > { %v2164_v17 = vpop.permute.xlu0 %2163 }
0x1a1a   : > { %v2169_v48 = vsel %vm361_vm2, %v2164_v17, 0 }
0x1a1b   : > { %3204 = vmatpush3.bf16.msra.mxu1 %v2169_v48 }
0x1a1c   : > { %3215 = vmatprep.subr.bf16.mxu1 %v3654_v0 }
0x1a1e   : > { %3206 = vmatmul.mubr.msk.bf16.vlgmr.msra.gmra.mrb[64].mxu1 %vm341_vm0, %v2160_v44 }
0x1a1f   : > { %3217 = vmatprep.mubr.msk.bf16.mxu1 %vm3655_vm1, %v3654_v0 }
0x1a93   : > { %v2252_v25 = vpop.f32.mrb[64].mxu0 }
0x1a94   : > { %v2258_v49 = vpack.c.bf16 %v2252_v25, %v2252_v25  ;;  %v3213_v22 = vpop.f32.mrb[65].mxu0  ;;  %v2620_v25 = vld [vmem:[%s3949_s12] sm:$0xff]  ;;  %s3672_s12 = smov [#allocation14]  }
0x1a95   : > { %v2255_v50 = vpop.f32.mrb[66].mxu0  ;;  %s3555_s10 = sshll.u32 %s3672_s12, 4  ;;  %s3556_s10 = int_to_ptr.vmem [resolvable:$false] %s3555_s10 }
0x1a96   : > { %v3214_v51 = vpop.f32.mrb[67].mxu0  ;;  %v2314_v52 = vsel %vm361_vm2, %v2258_v49, 0  ;;  %s3557_s8 = scalar_lea.vmem %s3556_s10, 256  ;;  %p3558_p7 = scmp.lt.s32.totalorder %s4367_s30, %s3556_s10 }
0x1a97   : > { %3222 = vmatpush3.bf16.msra.mxu0 %v2314_v52  ;;  %p3559_p12 = scmp.lt.s32.totalorder %s3557_s8, %s3551_s28 }
0x1a98   : > { %3233 = vmatprep.subr.bf16.mxu0 %v3654_v0 }
0x1a99   : > { %p3560_p4 = por %p3559_p12, %p3558_p7 }
0x1a9a   : > { %3224 = vmatmul.mubr.msk.bf16.vlgmr.msra.gmra.mrb[68].mxu0 %vm341_vm0, %v2258_v49 }
0x1a9b   : > { %3235 = vmatprep.mubr.msk.bf16.mxu0 %vm3655_vm1, %v3654_v0  ;;  %p3561_p6 = pnand %p3560_p4, %p3554_p9 }
0x1aa0   : > { %3234 = vmatpush3.bf16.xpose.msra.mxu0 %v4267_v18 }
0x1aa1   : > { %3251 = vmatprep.subr.bf16.mxu0 %v3654_v0 }
0x1af1   : > { %v2205_v53 = vpop.f32.mrb[64].mxu1 }
0x1af2   : > { %2212 = vrot.lane.b32.xlu0 %v2205_v53, %s3665_s17  ;;  %v3207_v55 = vpop.f32.mrb[65].mxu1 }
0x1af3   : > { %v2208_v56 = vpop.f32.mrb[66].mxu1 }
0x1af4   : > { %v3208_v57 = vpop.f32.mrb[67].mxu1 }
0x1b64   : > { %v2213_v58 = vpop.permute.xlu0 %2212 }
0x1b65   : > { %v2215_v59 = vadd.f32 %v2213_v58, %v2112_v39 }
0x1b67   : > { %v2259_v60 = vpack.c.bf16 %v2215_v59, %v2215_v59 }
0x1b69   : > { %2261 = vrot.lane.b32.xlu0 %v2259_v60, %s3671_s7 }
0x1b6d   : > { %v2350_v61 = vpop.f32.mrb[68].mxu0 }
0x1b6e   : > { %v3225_v62 = vpop.f32.mrb[69].mxu0  ;;  %v2356_v21 = vpack.c.bf16 %v2350_v61, %v2350_v61 }
0x1b6f   : > { %v2353_v63 = vpop.f32.mrb[70].mxu0 }
0x1b70   : > { %v3226_v4 = vpop.f32.mrb[71].mxu0 }
0x1bdb   : > { %v2262_v7 = vpop.permute.xlu0 %2261 }
0x1bdc   : > { %v2267_v19 = vsel %vm361_vm2, %v2262_v7, 0 }
0x1bdd   : > { %3216 = vmatpush3.bf16.msra.mxu1 %v2267_v19 }
0x1bde   : > { %3227 = vmatprep.subr.bf16.mxu1 %v3654_v0 }
0x1be0   : > { %3218 = vmatmul.mubr.msk.bf16.vlgmr.msra.gmra.mrb[68].mxu1 %vm341_vm0, %v2258_v49 }
0x1be1   : > { %3229 = vmatprep.mubr.msk.bf16.mxu1 %vm3655_vm1, %v3654_v0 }
0x1cb3   : > { %v2303_v8 = vpop.f32.mrb[68].mxu1 }
0x1cb4   : > { %2310 = vrot.lane.b32.xlu0 %v2303_v8, %s3665_s17  ;;  %v3219_v9 = vpop.f32.mrb[69].mxu1 }
0x1cb5   : > { %v2306_v10 = vpop.f32.mrb[70].mxu1 }
0x1cb6   : > { %v3220_v11 = vpop.f32.mrb[71].mxu1 }
0x1cb8   : > { %2418 = vrot.lane.b32.xlu0 %v3981_v2, %s3664_s6 }
0x1d26   : > { %v2311_v46 = vpop.permute.xlu0 %2310 }
0x1d27   : > { %v2313_v16 = vadd.f32 %v2311_v46, %v2215_v59 }
0x1d29   : > { %v2357_v18 = vpack.c.bf16 %v2313_v16, %v2313_v16 }
0x1d2a   : > { %v2419_v6 = vpop.permute.xlu0 %2418 }
0x1d2b   : > { %2359 = vrot.lane.b32.xlu1 %v2357_v18, %s3671_s7  ;;  %3236 = vmatmul.mubr.msk.bf16.vlgmr.msra.gmra.mrb[72].mxu0 %vm341_vm0, %v2419_v6 }
0x1d2c   : > { %3253 = vmatprep.mubr.msk.bf16.mxu0 %vm3655_vm1, %v3654_v0 }
0x1d9d   : > { %v2360_v47 = vpop.permute.xlu1 %2359 }
0x1d9e   : > { %v2365_v20 = vsel %vm361_vm2, %v2360_v47, 0 }
0x1d9f   : > { %3228 = vmatpush3.bf16.msra.mxu1 %v2365_v20 }
0x1da0   : > { %3239 = vmatprep.subr.bf16.mxu1 %v3654_v0 }
0x1da2   : > { %3230 = vmatmul.mubr.msk.bf16.vlgmr.msra.gmra.mrb[72].mxu1 %vm341_vm0, %v2356_v21 }
0x1da3   : > { %3241 = vmatprep.mubr.msk.bf16.mxu1 %vm3655_vm1, %v3654_v0 }
0x1dfe   : > { %v2457_v27 = vpop.f32.mrb[72].mxu0 }
0x1dff   : > { %v3237_v28 = vpop.f32.mrb[73].mxu0  ;;  %v2463_v35 = vmul.f32 %v2457_v27, %v4058_v14 }
0x1e00   : > { %v2460_v29 = vpop.f32.mrb[74].mxu0 }
0x1e01   : > { %v3238_v30 = vpop.f32.mrb[75].mxu0  ;;  %v2464_v37 = vpack.c.bf16 %v2463_v35, %v2463_v35 }
0x1e75   : > { %v2401_v2 = vpop.f32.mrb[72].mxu1 }
0x1e76   : > { %2408 = vrot.lane.b32.xlu1 %v2401_v2, %s3665_s17  ;;  %v3231_v23 = vpop.f32.mrb[73].mxu1 }
0x1e77   : > { %v2404_v1 = vpop.f32.mrb[74].mxu1 }
0x1e78   : > { %v3232_v26 = vpop.f32.mrb[75].mxu1 }
0x1e7a   : > { %1417 = vrot.lane.b32.xlu1 %v4195_v54, %s3671_s7 }
0x1ee8   : > { %v2409_v31 = vpop.permute.xlu1 %2408 }
0x1ee9   : > { %v2411_v32 = vadd.f32 %v2409_v31, %v2313_v16 }
0x1eeb   : > { %2413 = vrot.lane.b32.xlu0 %v2411_v32, %s3671_s7 }
0x1eec   : > { %v1418_v33 = vpop.permute.xlu1 %1417 }
0x1eed   : > { %1421 = vst.msk [vmem:[#allocation3] sm:$0xff] %vm1420_vm3, %v1418_v33 }
0x1eef   : > { %1985 = vrot.lane.b32.xlu0 %v4288_v5, %s3668_s29  ;;  %v3406_v5 = vld [vmem:[#allocation13 + $0x8] sm:$0xff]  }
0x1f0d   : > { %2559 = vxpose.xlu0.c.b16.start.end [1/1] (short) (narrow) %v4259_v13, 16  ;;  %v3405_v13 = vld [vmem:[#allocation13] sm:$0xff]  }
0x1f5d   : > { %v2414_v34 = vpop.permute.xlu0 %2413 }
0x1f5e   : > { %2416 = vst.msk [vmem:[#allocation4] sm:$0xff] %vm341_vm0, %v2414_v34 }
0x1f61   : > { %v1986_v54 = vpop.permute.xlu0 %1985 }
0x1f62   : > { %1989 = vst.msk [vmem:[#allocation3] sm:$0xff] %vm1988_vm4, %v1986_v54 }
0x1f65   : > { %v2417_v45 = vld [vmem:[#allocation4] sm:$0xff] }
0x1f66   : > { %v2465_v36 = vpack.c.bf16 %v2417_v45, %v2417_v45 }
0x1f68   : > { %v2470_v38 = vsel %vm361_vm2, %v2465_v36, 0 }
0x1f69   : > { %3240 = vmatpush3.bf16.msra.mxu1 %v2470_v38  ;;  %3252 = vmatpush3.bf16.msra.mxu0 %v2470_v38 }
0x1f6a   : > { %3245 = vmatprep.subr.bf16.mxu1 %v3654_v0  ;;  %3257 = vmatprep.subr.bf16.mxu0 %v3654_v0 }
0x1f6c   : > { %3242 = vmatmul.mubr.msk.bf16.vlgmr.msra.gmra.mrb[76].mxu1 %vm341_vm0, %v2464_v37 }
0x1f6d   : > { %3246 = vmatpush3.bf16.msra.mxu1 %v4262_v15  ;;  %3247 = vmatprep.mubr.msk.bf16.mxu1 %vm3655_vm1, %v3654_v0 }
0x1f73   : > { %v2567_v14 = vpop.trf.xlu0 }
0x1f74   : > { %3254 = vmatmul.mubr.msk.bf16.vlgmr.msra.gmra.mrb[76].mxu0 %vm341_vm0, %v2567_v14 }
0x1f75   : > { %3261 = vmatprep.mubr.msk.bf16.mxu0 %vm3655_vm1, %v3654_v0  ;;  %3258 = vmatpush3.bf16.msra.mxu0 %v3405_v13 }
0x1f76   : > { %3259 = vmatprep.subr.bf16.mxu0 %v3654_v0 }
0x1f78   : > { %3248 = vmatmul.mubr.msk.bf16.vlgmr.msra.gmra.mrb[76].mxu1 %vm341_vm0, %v2419_v6 }
0x1f79   : > { %3260 = vmatpush3.bf16.msra.mxu0 %v3406_v5 }
0x2047   : > { %v2612_v44 = vpop.f32.mrb[76].mxu0 }
0x2048   : > { %v2618_v0 = vadd.f32 %v2612_v44, %v4251_v12  ;;  %v3255_v24 = vpop.f32.mrb[77].mxu0 }
0x2049   : > { %v2615_v17 = vpop.f32.mrb[78].mxu0 }
0x204a   : > { %2619 = vst.msk [vmem:[#allocation2 + $0x18] sm:$0xff] %vm341_vm0, %v2618_v0  ;;  %v3256_v48 = vpop.f32.mrb[79].mxu0 }
0x204b   : > { %v2546_v39 = vpop.f32.mrb[76].mxu1 }
0x204c   : > { %2553 = vrot.lane.b32.xlu1 %v2546_v39, %s3663_s13  ;;  %v3249_v15 = vpop.f32.mrb[77].mxu1 }
0x204d   : > { %v2549_v3 = vpop.f32.mrb[78].mxu1 }
0x204e   : > { %v3250_v40 = vpop.f32.mrb[79].mxu1 }
0x20be   : > { %v2554_v41 = vpop.permute.xlu1 %2553 }
0x20bf   : > { %2557 = vst.msk [vmem:[#allocation3] sm:$0xff] %vm2556_vm5, %v2554_v41 }
0x20c6   : > { %v2621_v42 = vld [vmem:[#allocation3] sm:$0xff] }
0x20c7   : > { %v2622_v43 = vpack.c.bf16 %v2621_v42, %v2621_v42 }
0x20c9   : > { %3262 = vmatmul.mubr.msk.bf16.vlgmr.msra.gmra.mrb[80].mxu0 %vm2639_vm6, %v2622_v43 }
0x219c   : > { %v2677_v49 = vpop.f32.mrb[80].mxu0 }
0x219d   : > { %v2683_v22 = vadd.f32 %v2677_v49, %v2620_v25  ;;  %v3263_v50 = vpop.f32.mrb[81].mxu0 }
0x219e   : > { %v2680_v12 = vpop.f32.mrb[82].mxu0 }
0x219f   : > { %v3264_v51 = vpop.f32.mrb[83].mxu0  ;;  %2684 = vst.msk [vmem:[%s335_s0] sm:$0xff] %vm2639_vm6, %v2683_v22 }
0x21a0   : > { %3564 = shalt.err (!%p3561_p6)
}
0x21a1   : > { %s3565_s3 = scalar_lea.hbm %s4365_s15, 128  ;;  %s3569_s17 = scalar_lea.hbm %s4420_s5, 256 }
0x21a2   : > { %p3566_p2 = scmp.ne.s32.totalorder %s4365_s15, %s3565_s3  ;;  %p3570_p8 = scmp.lt.u32.totalorder %s4365_s15, %s4420_s5 }
0x21a3   : > { %p3571_p11 = scmp.lt.u32.totalorder %s3569_s17, %s3565_s3  ;;  %p3573_p5 = scmp.lt.u32.totalorder %s3565_s3, %s4365_s15 }
0x21a4   : > { %p3567_p3 = pnand %p3566_p2, %p4446_p10 }
0x21a5   : > { %p3572_p0 = por %p3571_p11, %p3570_p8 }
0x21a6   : > { %p3568_p1 = pneg %p3567_p3 }
0x21a7   : > { %p3574_p13 = por %p3573_p5, %p3572_p0 }
0x21a9   : > { %p3575_p9 = pnand %p3574_p13, %p3568_p1 }
0x21ab   : > { %3578 = shalt.err (!%p3575_p9)
}
0x21ac   : > { %3297 = dma.vmem_to_hbm [thread:$0]  (%p4446_p10), %s4367_s30, 128, %s4365_s15, %s2686_s21  }
0x21ad PF: > { %s2712_s2 = sand.u32 1, %s3625_s18   ;;  %p4447_p7 = scmp.ne.s32.totalorder %s4429_s27, 0 }
0x21ae   : > { %p4448_p12 = scmp.ge.s32.totalorder %s3645_s23, 2  ;;  %s2713_s7 = scalar_lea.sflag [#allocation7], %s2712_s2 }
0x21b0   : > { %p3317_p4 = pnand %p4448_p12, %p4447_p7 }
0x21b2   : > { %3620 = dma.done.wait (!%p3317_p4), %s2713_s7, 128  }
0x21b3   : > { %3622 = vsyncadd (!%p3317_p4), %s2713_s7, 4294967168  ;;  %s25_s23 = sadd.s32 1, %s3645_s23   ;;  %s4449_s18 = smov %s3629_s19 }
0x21b4   : > { %p22_p6 = scmp.ge.s32.totalorder %s25_s23, 4   ;;  %s4450_s19 = smov %s3633_s20 }
0x21b5   : > { %s4451_s20 = smov %s3862_s14  ;;  %s4452_s21 = smov %s3641_s22 }
0x21b6   : > { %s4453_s22 = smov %s4455_s9  ;;  %24 = sbr.rel (!%p22_p6) target bundleno = 13 (0xd), region = 117 }
0x21bd   :  { %2718 = vsyncpa [#allocation6], 1 }
0x21be   :  { %2720 = vsyncpa [#allocation6 + $0x1], 1 }
0x21bf   :  { %2721 = vsyncpa [#allocation9], 1 }
0x21c0   :  { %2723 = vsyncpa [#allocation9 + $0x1], 1 }
0x21c1   :  { %2724 = vsyncpa [#allocation12], 1 }
0x21c2   :  { %2725 = vsyncpa [#allocation7], 1 }
0x21c3   :  { %2727 = vsyncpa [#allocation7 + $0x1], 1 }

</bundles_post_ra>
